<compile_context>
chip_gen: v7x
topology: tpu7x:2x2x1
jax: 0.10.0
libtpu: 0.0.40
codegen_flags: <defaults>
</compile_context>

<pallas_src>
import functools

import jax
import jax.numpy as jnp
import numpy as np
from jax import lax
from jax.experimental import pallas as pl
from jax.experimental.pallas import tpu as pltpu

BN_EPS = 1e-5
_VMEM_LIMIT_BYTES = 32 * 1024 * 1024  # safe scoped limit on v5e/v6e/v7x


def _round_up(x, m):
    return (x + m - 1) // m * m


# ----------------- phase 1: conv via in-kernel im2col + batch stats ---------
def _conv_stats_kernel(x_ref, w_ref, mask_ref, y_ref, sum_ref, sq_ref,
                       acc_ref, *, ksize, width, rows, cin_p, compute_dtype):
    # x_ref:    (hw_pad, cin_p)         one image, flat NHWC, f32
    # w_ref:    (k*k*cin_p, c_pad)      conv weights, resident (DMA'd once)
    # mask_ref: (rows, 1)               1.0 on real output positions, else 0.0
    # y_ref:    (rows, c_pad)           raw conv output (compute dtype)
    # sum_ref:  (1, c_pad)              per-channel sum, resident per split
    # sq_ref:   (1, c_pad)              per-channel sum of squares, resident
    # acc_ref:  (rows, c_pad) f32       VMEM accumulator scratch
    b = pl.program_id(1)

    @pl.when(b == 0)
    def _init():
        sum_ref[...] = jnp.zeros_like(sum_ref)
        sq_ref[...] = jnp.zeros_like(sq_ref)

    # k*k shifted row-windows of the flat image, each contracted over the
    # (zero-padded) input channels and accumulated in f32.
    for di in range(ksize):
        for dj in range(ksize):
            sl = x_ref[pl.ds(di * width + dj, rows), :].astype(compute_dtype)
            wk = w_ref[pl.ds((di * ksize + dj) * cin_p, cin_p), :]
            d = jnp.dot(sl, wk, preferred_element_type=jnp.float32)
            if di == 0 and dj == 0:
                acc_ref[...] = d
            else:
                acc_ref[...] += d

    acc = acc_ref[...]
    # Mask out wrap-around columns / padded rows so they do not pollute the
    # batch statistics (the divisor in the glue uses the true N*Ho*Wo).
    yv = acc * mask_ref[...]
    sum_ref[...] += jnp.sum(yv, axis=0, keepdims=True)
    sq_ref[...] += jnp.sum(yv * yv, axis=0, keepdims=True)

    y_ref[...] = acc.astype(y_ref.dtype)


# ----------------- phase 2: folded-affine BN + ReLU --------------------------
def _bn_relu_kernel(y_ref, a_ref, b_ref, o_ref):
    # y_hat = y * a + b  (a = gamma*inv_std, b = beta - mu*a), then ReLU.
    y = y_ref[...].astype(jnp.float32)
    o_ref[...] = jnp.maximum(y * a_ref[...] + b_ref[...], 0.0)


@functools.partial(
    jax.jit, static_argnames=("ksize", "compute_dtype", "out_layout"))
def conv2d_bn_relu(x_nchw, weight, gamma, beta, *, ksize,
                   compute_dtype=jnp.bfloat16, out_layout="NCHW"):
    """x_nchw: (N, Cin, H, W); weight: (Cout, Cin, k, k)  (PyTorch layouts)."""
    n, cin, h, w = x_nchw.shape
    cout = weight.shape[0]
    ho, wo = h - ksize + 1, w - ksize + 1

    cin_p = _round_up(cin, 8)                     # sublane-aligned contraction
    c_pad = _round_up(cout, 128)                  # lane-dense output channels
    rows = _round_up((ho - 1) * w + wo, 16)       # flat output rows per image
    need_hw = (ksize - 1) * (w + 1) + rows        # max in-kernel slice end
    hw_pad = _round_up(max(h * w, need_hw), 8)

    n_split = 2 if (n >= 2 and n % 2 == 0) else 1  # v7x: one TC per split
    n_per = n // n_split

    itemsize = np.dtype(compute_dtype).itemsize

    # --- input prep: NCHW -> flat NHWC (one XLA copy; kernel reads it once) --
    x_flat = jnp.transpose(x_nchw, (0, 2, 3, 1)).reshape(n, h * w, cin)
    x_flat = jnp.pad(x_flat.astype(jnp.float32),
                     ((0, 0), (0, hw_pad - h * w), (0, cin_p - cin)))

    # --- weights: (Cout,Cin,kh,kw) -> (kh*kw*Cin_p, C_pad)  (tiny) -----------
    w_k = jnp.transpose(weight, (2, 3, 1, 0)).reshape(ksize * ksize, cin, cout)
    w_k = jnp.pad(w_k, ((0, 0), (0, cin_p - cin), (0, c_pad - cout)))
    w_mat = w_k.reshape(ksize * ksize * cin_p, c_pad).astype(compute_dtype)

    # --- validity mask over the `rows` flat output positions of one image ---
    ridx = np.arange(rows)
    mask_np = ((ridx % w < wo) & (ridx // w < ho)).astype(np.float32)
    row_mask = jnp.asarray(mask_np).reshape(rows, 1)

    kernel = functools.partial(_conv_stats_kernel, ksize=ksize, width=w,
                               rows=rows, cin_p=cin_p,
                               compute_dtype=compute_dtype)

    flops1 = 2 * n * rows * cin_p * c_pad * ksize * ksize
    bytes1 = (x_flat.size * 4 + w_mat.size * itemsize
              + n * rows * c_pad * itemsize + 2 * n_split * c_pad * 4)

    y, ysum, ysq = pl.pallas_call(
        kernel,
        out_shape=(
            jax.ShapeDtypeStruct((n, rows, c_pad), compute_dtype),
            jax.ShapeDtypeStruct((n_split, 1, c_pad), jnp.float32),
            jax.ShapeDtypeStruct((n_split, 1, c_pad), jnp.float32),
        ),
        grid_spec=pltpu.PrefetchScalarGridSpec(
            num_scalar_prefetch=0,
            grid=(n_split, n_per),
            in_specs=[
                pl.BlockSpec((None, hw_pad, cin_p),
                             lambda s, b: (s * n_per + b, 0, 0)),
                pl.BlockSpec((ksize * ksize * cin_p, c_pad),
                             lambda s, b: (0, 0)),            # resident
                pl.BlockSpec((rows, 1), lambda s, b: (0, 0)),  # resident
            ],
            out_specs=[
                pl.BlockSpec((None, rows, c_pad),
                             lambda s, b: (s * n_per + b, 0, 0)),
                pl.BlockSpec((None, 1, c_pad), lambda s, b: (s, 0, 0)),
                pl.BlockSpec((None, 1, c_pad), lambda s, b: (s, 0, 0)),
            ],
            scratch_shapes=[pltpu.VMEM((rows, c_pad), jnp.float32)],
        ),
        compiler_params=pltpu.CompilerParams(
            dimension_semantics=("parallel", "arbitrary"),
            vmem_limit_bytes=_VMEM_LIMIT_BYTES),
        cost_estimate=pl.CostEstimate(flops=flops1, transcendentals=0,
                                      bytes_accessed=bytes1),
    )(x_flat, w_mat, row_mask)

    # --- BN batch statistics + folded affine (tiny, plain JAX) ---------------
    m_valid = n * ho * wo
    ssum = jnp.sum(ysum, axis=0)[0]
    ssq = jnp.sum(ysq, axis=0)[0]
    mu = ssum / m_valid
    var = jnp.maximum(ssq / m_valid - mu * mu, 0.0)   # biased (training) var
    gamma_pad = jnp.pad(gamma.astype(jnp.float32), (0, c_pad - cout))
    beta_pad = jnp.pad(beta.astype(jnp.float32), (0, c_pad - cout))
    a_vec = gamma_pad * lax.rsqrt(var + BN_EPS)
    b_vec = beta_pad - mu * a_vec

    # --- phase 2: normalize + ReLU (parallel streaming over images) ----------
    flops2 = 3 * n * rows * c_pad
    bytes2 = n * rows * c_pad * (itemsize + 4) + 2 * c_pad * 4

    out = pl.pallas_call(
        _bn_relu_kernel,
        out_shape=jax.ShapeDtypeStruct((n, rows, c_pad), jnp.float32),
        grid_spec=pltpu.PrefetchScalarGridSpec(
            num_scalar_prefetch=0,
            grid=(n,),
            in_specs=[
                pl.BlockSpec((None, rows, c_pad), lambda i: (i, 0, 0)),
                pl.BlockSpec((1, c_pad), lambda i: (0, 0)),   # a, resident
                pl.BlockSpec((1, c_pad), lambda i: (0, 0)),   # b, resident
            ],
            out_specs=pl.BlockSpec((None, rows, c_pad), lambda i: (i, 0, 0)),
        ),
        compiler_params=pltpu.CompilerParams(
            dimension_semantics=("parallel",),
            vmem_limit_bytes=_VMEM_LIMIT_BYTES),
        cost_estimate=pl.CostEstimate(flops=flops2, transcendentals=0,
                                      bytes_accessed=bytes2),
    )(y, a_vec.reshape(1, c_pad), b_vec.reshape(1, c_pad))

    # --- extract the real output (only Cout real channels are touched) -------
    o = out[:, :, :cout]                                   # (N, rows, Cout)
    if rows < ho * w:
        o = jnp.pad(o, ((0, 0), (0, ho * w - rows), (0, 0)))
    o = o[:, :ho * w, :].reshape(n, ho, w, cout)[:, :, :wo, :]   # NHWC
    if out_layout == "NCHW":
        o = jnp.transpose(o, (0, 3, 1, 2))                 # PyTorch layout
    return o


def _reference(x_nchw, weight, gamma, beta):
    """Pure-JAX reference: conv (valid, stride 1) + batch-stat BN + ReLU."""
    y = lax.conv_general_dilated(
        x_nchw, weight, window_strides=(1, 1), padding="VALID",
        dimension_numbers=("NCHW", "OIHW", "NCHW"))
    mu = jnp.mean(y, axis=(0, 2, 3), keepdims=True)
    var = jnp.mean((y - mu) ** 2, axis=(0, 2, 3), keepdims=True)
    y = (y - mu) * lax.rsqrt(var + BN_EPS)
    y = y * gamma.reshape(1, -1, 1, 1) + beta.reshape(1, -1, 1, 1)
    return jnp.maximum(y, 0.0)


if __name__ == "__main__":
    key = jax.random.PRNGKey(0)
    k_x, k_w = jax.random.split(key)

    N, CIN, H, W = 2, 4, 16, 16
    COUT, KSIZE = 8, 3

    x = jax.random.normal(k_x, (N, CIN, H, W), dtype=jnp.float32)
    weight = jax.random.normal(k_w, (COUT, CIN, KSIZE, KSIZE),
                               dtype=jnp.float32) * 0.1
    gamma = jnp.ones((COUT,), dtype=jnp.float32)   # BatchNorm2d default init
    beta = jnp.zeros((COUT,), dtype=jnp.float32)

    ref = jax.block_until_ready(_reference(x, weight, gamma, beta))

    # f32 compute path: tight check of the fused in-kernel-im2col semantics,
    # the batch-statistic accumulation across the 2-way parallel split, and
    # the wrap-around-row masking.
    out_f32 = jax.block_until_ready(
        conv2d_bn_relu(x, weight, gamma, beta, ksize=KSIZE,
                       compute_dtype=jnp.float32))
    np.testing.assert_allclose(np.asarray(out_f32), np.asarray(ref),
                               rtol=1e-3, atol=1e-3)

    # bf16 MXU path (production default: bf16 matmuls + bf16 intermediate y).
    out_bf16 = jax.block_until_ready(
        conv2d_bn_relu(x, weight, gamma, beta, ksize=KSIZE,
                       compute_dtype=jnp.bfloat16))
    np.testing.assert_allclose(np.asarray(out_bf16), np.asarray(ref),
                               rtol=5e-2, atol=7.5e-2)

    print("KERNEL_OK")
</pallas_src>

<mosaic_0001>
module attributes {stable_mosaic.version = 11 : i64} {
  func.func @_conv_stats_kernel(%arg0: i32, %arg1: i32, %arg2: memref<1x264x8xf32, #tpu.memory_space<vmem>>, %arg3: memref<72x128xf32, #tpu.memory_space<vmem>>, %arg4: memref<224x1xf32, #tpu.memory_space<vmem>>, %arg5: memref<1x224x128xf32, #tpu.memory_space<vmem>>, %arg6: memref<1x1x128xf32, #tpu.memory_space<vmem>>, %arg7: memref<1x1x128xf32, #tpu.memory_space<vmem>>, %arg8: memref<224x128xf32, #tpu.memory_space<vmem>>) attributes {dimension_semantics = [#tpu.dimension_semantics<parallel>, #tpu.dimension_semantics<arbitrary>], iteration_bounds = array<i64: 2, 1>, scalar_prefetch = 0 : i64, scratch_operands = 1 : i64, tpu.core_type = #tpu.core_type<tc>, window_params = [{transform_indices = @transform_0, window_bounds = array<i64: 1, 264, 8>}, {pipeline_mode = #tpu.pipeline_mode<synchronous>, transform_indices = @transform_1, window_bounds = array<i64: 72, 128>}, {pipeline_mode = #tpu.pipeline_mode<synchronous>, transform_indices = @transform_2, window_bounds = array<i64: 224, 1>}, {transform_indices = @transform_3, window_bounds = array<i64: 1, 224, 128>}, {transform_indices = @transform_4, window_bounds = array<i64: 1, 1, 128>}, {transform_indices = @transform_5, window_bounds = array<i64: 1, 1, 128>}]} {
    %c0_i32 = arith.constant 0 : i32
    %0 = arith.cmpi eq, %arg1, %c0_i32 : i32
    %1 = arith.extui %0 : i1 to i32
    %c0_i32_0 = arith.constant 0 : i32
    %2 = arith.cmpi ne, %1, %c0_i32_0 : i32
    scf.if %2 {
      %cst_94 = arith.constant 0.000000e+00 : f32
      %88 = vector.broadcast %cst_94 : f32 to vector<1x128xf32>
      %c0_95 = arith.constant 0 : index
      %c0_96 = arith.constant 0 : index
      %c0_97 = arith.constant 0 : index
      %89 = vector.load %arg6[%c0_95, %c0_96, %c0_97] : memref<1x1x128xf32, #tpu.memory_space<vmem>>, vector<1x1x128xf32>
      %90 = vector.shape_cast %89 : vector<1x1x128xf32> to vector<1x128xf32>
      %91 = vector.shape_cast %88 : vector<1x128xf32> to vector<1x1x128xf32>
      tpu.vector_store %arg6[%c0_95, %c0_96, %c0_97], %91 {strides = array<i32>} : memref<1x1x128xf32, #tpu.memory_space<vmem>>, vector<1x1x128xf32>,
      %cst_98 = arith.constant 0.000000e+00 : f32
      %92 = vector.broadcast %cst_98 : f32 to vector<1x128xf32>
      %c0_99 = arith.constant 0 : index
      %c0_100 = arith.constant 0 : index
      %c0_101 = arith.constant 0 : index
      %93 = vector.load %arg7[%c0_99, %c0_100, %c0_101] : memref<1x1x128xf32, #tpu.memory_space<vmem>>, vector<1x1x128xf32>
      %94 = vector.shape_cast %93 : vector<1x1x128xf32> to vector<1x128xf32>
      %95 = vector.shape_cast %92 : vector<1x128xf32> to vector<1x1x128xf32>
      tpu.vector_store %arg7[%c0_99, %c0_100, %c0_101], %95 {strides = array<i32>} : memref<1x1x128xf32, #tpu.memory_space<vmem>>, vector<1x1x128xf32>,
    } else {
    }
    %c0 = arith.constant 0 : index
    %c0_1 = arith.constant 0 : index
    %c0_2 = arith.constant 0 : index
    %3 = vector.load %arg2[%c0, %c0_1, %c0_2] : memref<1x264x8xf32, #tpu.memory_space<vmem>>, vector<1x224x8xf32>
    %4 = vector.shape_cast %3 : vector<1x224x8xf32> to vector<224x8xf32>
    %c0_3 = arith.constant 0 : index
    %c0_4 = arith.constant 0 : index
    %5 = vector.load %arg3[%c0_3, %c0_4] : memref<72x128xf32, #tpu.memory_space<vmem>>, vector<8x128xf32>
    %cst = arith.constant dense<0.000000e+00> : vector<224x128xf32>
    %6 = tpu.matmul %4, %5, %cst {dimension_numbers = #tpu.dot_dimension_numbers<[1], [0], [0], [1], [0, 0, 1, 1], [], []>} : vector<224x8xf32>, vector<8x128xf32>, vector<224x128xf32> -> vector<224x128xf32>
    %c0_5 = arith.constant 0 : index
    %c0_6 = arith.constant 0 : index
    %7 = vector.load %arg8[%c0_5, %c0_6] : memref<224x128xf32, #tpu.memory_space<vmem>>, vector<224x128xf32>
    tpu.vector_store %arg8[%c0_5, %c0_6], %6 {strides = array<i32>} : memref<224x128xf32, #tpu.memory_space<vmem>>, vector<224x128xf32>,
    %c0_7 = arith.constant 0 : index
    %c1 = arith.constant 1 : index
    %c0_8 = arith.constant 0 : index
    %8 = vector.load %arg2[%c0_7, %c1, %c0_8] : memref<1x264x8xf32, #tpu.memory_space<vmem>>, vector<1x224x8xf32>
    %9 = vector.shape_cast %8 : vector<1x224x8xf32> to vector<224x8xf32>
    %c8 = arith.constant 8 : index
    %c0_9 = arith.constant 0 : index
    %10 = vector.load %arg3[%c8, %c0_9] : memref<72x128xf32, #tpu.memory_space<vmem>>, vector<8x128xf32>
    %cst_10 = arith.constant dense<0.000000e+00> : vector<224x128xf32>
    %11 = tpu.matmul %9, %10, %cst_10 {dimension_numbers = #tpu.dot_dimension_numbers<[1], [0], [0], [1], [0, 0, 1, 1], [], []>} : vector<224x8xf32>, vector<8x128xf32>, vector<224x128xf32> -> vector<224x128xf32>
    %c0_11 = arith.constant 0 : index
    %c0_12 = arith.constant 0 : index
    %12 = vector.load %arg8[%c0_11, %c0_12] : memref<224x128xf32, #tpu.memory_space<vmem>>, vector<224x128xf32>
    %13 = arith.addf %12, %11 : vector<224x128xf32>
    %c0_13 = arith.constant 0 : index
    %c0_14 = arith.constant 0 : index
    %14 = vector.load %arg8[%c0_13, %c0_14] : memref<224x128xf32, #tpu.memory_space<vmem>>, vector<224x128xf32>
    tpu.vector_store %arg8[%c0_13, %c0_14], %13 {strides = array<i32>} : memref<224x128xf32, #tpu.memory_space<vmem>>, vector<224x128xf32>,
    %c0_15 = arith.constant 0 : index
    %c2 = arith.constant 2 : index
    %c0_16 = arith.constant 0 : index
    %15 = vector.load %arg2[%c0_15, %c2, %c0_16] : memref<1x264x8xf32, #tpu.memory_space<vmem>>, vector<1x224x8xf32>
    %16 = vector.shape_cast %15 : vector<1x224x8xf32> to vector<224x8xf32>
    %c16 = arith.constant 16 : index
    %c0_17 = arith.constant 0 : index
    %17 = vector.load %arg3[%c16, %c0_17] : memref<72x128xf32, #tpu.memory_space<vmem>>, vector<8x128xf32>
    %cst_18 = arith.constant dense<0.000000e+00> : vector<224x128xf32>
    %18 = tpu.matmul %16, %17, %cst_18 {dimension_numbers = #tpu.dot_dimension_numbers<[1], [0], [0], [1], [0, 0, 1, 1], [], []>} : vector<224x8xf32>, vector<8x128xf32>, vector<224x128xf32> -> vector<224x128xf32>
    %c0_19 = arith.constant 0 : index
    %c0_20 = arith.constant 0 : index
    %19 = vector.load %arg8[%c0_19, %c0_20] : memref<224x128xf32, #tpu.memory_space<vmem>>, vector<224x128xf32>
    %20 = arith.addf %19, %18 : vector<224x128xf32>
    %c0_21 = arith.constant 0 : index
    %c0_22 = arith.constant 0 : index
    %21 = vector.load %arg8[%c0_21, %c0_22] : memref<224x128xf32, #tpu.memory_space<vmem>>, vector<224x128xf32>
    tpu.vector_store %arg8[%c0_21, %c0_22], %20 {strides = array<i32>} : memref<224x128xf32, #tpu.memory_space<vmem>>, vector<224x128xf32>,
    %c0_23 = arith.constant 0 : index
    %c16_24 = arith.constant 16 : index
    %c0_25 = arith.constant 0 : index
    %22 = vector.load %arg2[%c0_23, %c16_24, %c0_25] : memref<1x264x8xf32, #tpu.memory_space<vmem>>, vector<1x224x8xf32>
    %23 = vector.shape_cast %22 : vector<1x224x8xf32> to vector<224x8xf32>
    %c24 = arith.constant 24 : index
    %c0_26 = arith.constant 0 : index
    %24 = vector.load %arg3[%c24, %c0_26] : memref<72x128xf32, #tpu.memory_space<vmem>>, vector<8x128xf32>
    %cst_27 = arith.constant dense<0.000000e+00> : vector<224x128xf32>
    %25 = tpu.matmul %23, %24, %cst_27 {dimension_numbers = #tpu.dot_dimension_numbers<[1], [0], [0], [1], [0, 0, 1, 1], [], []>} : vector<224x8xf32>, vector<8x128xf32>, vector<224x128xf32> -> vector<224x128xf32>
    %c0_28 = arith.constant 0 : index
    %c0_29 = arith.constant 0 : index
    %26 = vector.load %arg8[%c0_28, %c0_29] : memref<224x128xf32, #tpu.memory_space<vmem>>, vector<224x128xf32>
    %27 = arith.addf %26, %25 : vector<224x128xf32>
    %c0_30 = arith.constant 0 : index
    %c0_31 = arith.constant 0 : index
    %28 = vector.load %arg8[%c0_30, %c0_31] : memref<224x128xf32, #tpu.memory_space<vmem>>, vector<224x128xf32>
    tpu.vector_store %arg8[%c0_30, %c0_31], %27 {strides = array<i32>} : memref<224x128xf32, #tpu.memory_space<vmem>>, vector<224x128xf32>,
    %c0_32 = arith.constant 0 : index
    %c17 = arith.constant 17 : index
    %c0_33 = arith.constant 0 : index
    %29 = vector.load %arg2[%c0_32, %c17, %c0_33] : memref<1x264x8xf32, #tpu.memory_space<vmem>>, vector<1x224x8xf32>
    %30 = vector.shape_cast %29 : vector<1x224x8xf32> to vector<224x8xf32>
    %c32 = arith.constant 32 : index
    %c0_34 = arith.constant 0 : index
    %31 = vector.load %arg3[%c32, %c0_34] : memref<72x128xf32, #tpu.memory_space<vmem>>, vector<8x128xf32>
    %cst_35 = arith.constant dense<0.000000e+00> : vector<224x128xf32>
    %32 = tpu.matmul %30, %31, %cst_35 {dimension_numbers = #tpu.dot_dimension_numbers<[1], [0], [0], [1], [0, 0, 1, 1], [], []>} : vector<224x8xf32>, vector<8x128xf32>, vector<224x128xf32> -> vector<224x128xf32>
    %c0_36 = arith.constant 0 : index
    %c0_37 = arith.constant 0 : index
    %33 = vector.load %arg8[%c0_36, %c0_37] : memref<224x128xf32, #tpu.memory_space<vmem>>, vector<224x128xf32>
    %34 = arith.addf %33, %32 : vector<224x128xf32>
    %c0_38 = arith.constant 0 : index
    %c0_39 = arith.constant 0 : index
    %35 = vector.load %arg8[%c0_38, %c0_39] : memref<224x128xf32, #tpu.memory_space<vmem>>, vector<224x128xf32>
    tpu.vector_store %arg8[%c0_38, %c0_39], %34 {strides = array<i32>} : memref<224x128xf32, #tpu.memory_space<vmem>>, vector<224x128xf32>,
    %c0_40 = arith.constant 0 : index
    %c18 = arith.constant 18 : index
    %c0_41 = arith.constant 0 : index
    %36 = vector.load %arg2[%c0_40, %c18, %c0_41] : memref<1x264x8xf32, #tpu.memory_space<vmem>>, vector<1x224x8xf32>
    %37 = vector.shape_cast %36 : vector<1x224x8xf32> to vector<224x8xf32>
    %c40 = arith.constant 40 : index
    %c0_42 = arith.constant 0 : index
    %38 = vector.load %arg3[%c40, %c0_42] : memref<72x128xf32, #tpu.memory_space<vmem>>, vector<8x128xf32>
    %cst_43 = arith.constant dense<0.000000e+00> : vector<224x128xf32>
    %39 = tpu.matmul %37, %38, %cst_43 {dimension_numbers = #tpu.dot_dimension_numbers<[1], [0], [0], [1], [0, 0, 1, 1], [], []>} : vector<224x8xf32>, vector<8x128xf32>, vector<224x128xf32> -> vector<224x128xf32>
    %c0_44 = arith.constant 0 : index
    %c0_45 = arith.constant 0 : index
    %40 = vector.load %arg8[%c0_44, %c0_45] : memref<224x128xf32, #tpu.memory_space<vmem>>, vector<224x128xf32>
    %41 = arith.addf %40, %39 : vector<224x128xf32>
    %c0_46 = arith.constant 0 : index
    %c0_47 = arith.constant 0 : index
    %42 = vector.load %arg8[%c0_46, %c0_47] : memref<224x128xf32, #tpu.memory_space<vmem>>, vector<224x128xf32>
    tpu.vector_store %arg8[%c0_46, %c0_47], %41 {strides = array<i32>} : memref<224x128xf32, #tpu.memory_space<vmem>>, vector<224x128xf32>,
    %c0_48 = arith.constant 0 : index
    %c32_49 = arith.constant 32 : index
    %c0_50 = arith.constant 0 : index
    %43 = vector.load %arg2[%c0_48, %c32_49, %c0_50] : memref<1x264x8xf32, #tpu.memory_space<vmem>>, vector<1x224x8xf32>
    %44 = vector.shape_cast %43 : vector<1x224x8xf32> to vector<224x8xf32>
    %c48 = arith.constant 48 : index
    %c0_51 = arith.constant 0 : index
    %45 = vector.load %arg3[%c48, %c0_51] : memref<72x128xf32, #tpu.memory_space<vmem>>, vector<8x128xf32>
    %cst_52 = arith.constant dense<0.000000e+00> : vector<224x128xf32>
    %46 = tpu.matmul %44, %45, %cst_52 {dimension_numbers = #tpu.dot_dimension_numbers<[1], [0], [0], [1], [0, 0, 1, 1], [], []>} : vector<224x8xf32>, vector<8x128xf32>, vector<224x128xf32> -> vector<224x128xf32>
    %c0_53 = arith.constant 0 : index
    %c0_54 = arith.constant 0 : index
    %47 = vector.load %arg8[%c0_53, %c0_54] : memref<224x128xf32, #tpu.memory_space<vmem>>, vector<224x128xf32>
    %48 = arith.addf %47, %46 : vector<224x128xf32>
    %c0_55 = arith.constant 0 : index
    %c0_56 = arith.constant 0 : index
    %49 = vector.load %arg8[%c0_55, %c0_56] : memref<224x128xf32, #tpu.memory_space<vmem>>, vector<224x128xf32>
    tpu.vector_store %arg8[%c0_55, %c0_56], %48 {strides = array<i32>} : memref<224x128xf32, #tpu.memory_space<vmem>>, vector<224x128xf32>,
    %c0_57 = arith.constant 0 : index
    %c33 = arith.constant 33 : index
    %c0_58 = arith.constant 0 : index
    %50 = vector.load %arg2[%c0_57, %c33, %c0_58] : memref<1x264x8xf32, #tpu.memory_space<vmem>>, vector<1x224x8xf32>
    %51 = vector.shape_cast %50 : vector<1x224x8xf32> to vector<224x8xf32>
    %c56 = arith.constant 56 : index
    %c0_59 = arith.constant 0 : index
    %52 = vector.load %arg3[%c56, %c0_59] : memref<72x128xf32, #tpu.memory_space<vmem>>, vector<8x128xf32>
    %cst_60 = arith.constant dense<0.000000e+00> : vector<224x128xf32>
    %53 = tpu.matmul %51, %52, %cst_60 {dimension_numbers = #tpu.dot_dimension_numbers<[1], [0], [0], [1], [0, 0, 1, 1], [], []>} : vector<224x8xf32>, vector<8x128xf32>, vector<224x128xf32> -> vector<224x128xf32>
    %c0_61 = arith.constant 0 : index
    %c0_62 = arith.constant 0 : index
    %54 = vector.load %arg8[%c0_61, %c0_62] : memref<224x128xf32, #tpu.memory_space<vmem>>, vector<224x128xf32>
    %55 = arith.addf %54, %53 : vector<224x128xf32>
    %c0_63 = arith.constant 0 : index
    %c0_64 = arith.constant 0 : index
    %56 = vector.load %arg8[%c0_63, %c0_64] : memref<224x128xf32, #tpu.memory_space<vmem>>, vector<224x128xf32>
    tpu.vector_store %arg8[%c0_63, %c0_64], %55 {strides = array<i32>} : memref<224x128xf32, #tpu.memory_space<vmem>>, vector<224x128xf32>,
    %c0_65 = arith.constant 0 : index
    %c34 = arith.constant 34 : index
    %c0_66 = arith.constant 0 : index
    %57 = vector.load %arg2[%c0_65, %c34, %c0_66] : memref<1x264x8xf32, #tpu.memory_space<vmem>>, vector<1x224x8xf32>
    %58 = vector.shape_cast %57 : vector<1x224x8xf32> to vector<224x8xf32>
    %c64 = arith.constant 64 : index
    %c0_67 = arith.constant 0 : index
    %59 = vector.load %arg3[%c64, %c0_67] : memref<72x128xf32, #tpu.memory_space<vmem>>, vector<8x128xf32>
    %cst_68 = arith.constant dense<0.000000e+00> : vector<224x128xf32>
    %60 = tpu.matmul %58, %59, %cst_68 {dimension_numbers = #tpu.dot_dimension_numbers<[1], [0], [0], [1], [0, 0, 1, 1], [], []>} : vector<224x8xf32>, vector<8x128xf32>, vector<224x128xf32> -> vector<224x128xf32>
    %c0_69 = arith.constant 0 : index
    %c0_70 = arith.constant 0 : index
    %61 = vector.load %arg8[%c0_69, %c0_70] : memref<224x128xf32, #tpu.memory_space<vmem>>, vector<224x128xf32>
    %62 = arith.addf %61, %60 : vector<224x128xf32>
    %c0_71 = arith.constant 0 : index
    %c0_72 = arith.constant 0 : index
    %63 = vector.load %arg8[%c0_71, %c0_72] : memref<224x128xf32, #tpu.memory_space<vmem>>, vector<224x128xf32>
    tpu.vector_store %arg8[%c0_71, %c0_72], %62 {strides = array<i32>} : memref<224x128xf32, #tpu.memory_space<vmem>>, vector<224x128xf32>,
    %c0_73 = arith.constant 0 : index
    %c0_74 = arith.constant 0 : index
    %64 = vector.load %arg8[%c0_73, %c0_74] : memref<224x128xf32, #tpu.memory_space<vmem>>, vector<224x128xf32>
    %c0_75 = arith.constant 0 : index
    %c0_76 = arith.constant 0 : index
    %65 = vector.load %arg4[%c0_75, %c0_76] : memref<224x1xf32, #tpu.memory_space<vmem>>, vector<224x1xf32>
    %66 = vector.broadcast %65 : vector<224x1xf32> to vector<224x128xf32>
    %67 = arith.mulf %64, %66 : vector<224x128xf32>
    %c0_77 = arith.constant 0 : index
    %c0_78 = arith.constant 0 : index
    %c0_79 = arith.constant 0 : index
    %68 = vector.load %arg6[%c0_77, %c0_78, %c0_79] : memref<1x1x128xf32, #tpu.memory_space<vmem>>, vector<1x1x128xf32>
    %69 = vector.shape_cast %68 : vector<1x1x128xf32> to vector<1x128xf32>
    %cst_80 = arith.constant dense<0.000000e+00> : vector<128xf32>
    %70 = vector.multi_reduction <add>, %67, %cst_80 [0] : vector<224x128xf32> to vector<128xf32>
    %71 = vector.shape_cast %70 : vector<128xf32> to vector<1x128xf32>
    %72 = arith.addf %69, %71 : vector<1x128xf32>
    %c0_81 = arith.constant 0 : index
    %c0_82 = arith.constant 0 : index
    %c0_83 = arith.constant 0 : index
    %73 = vector.load %arg6[%c0_81, %c0_82, %c0_83] : memref<1x1x128xf32, #tpu.memory_space<vmem>>, vector<1x1x128xf32>
    %74 = vector.shape_cast %73 : vector<1x1x128xf32> to vector<1x128xf32>
    %75 = vector.shape_cast %72 : vector<1x128xf32> to vector<1x1x128xf32>
    tpu.vector_store %arg6[%c0_81, %c0_82, %c0_83], %75 {strides = array<i32>} : memref<1x1x128xf32, #tpu.memory_space<vmem>>, vector<1x1x128xf32>,
    %c0_84 = arith.constant 0 : index
    %c0_85 = arith.constant 0 : index
    %c0_86 = arith.constant 0 : index
    %76 = vector.load %arg7[%c0_84, %c0_85, %c0_86] : memref<1x1x128xf32, #tpu.memory_space<vmem>>, vector<1x1x128xf32>
    %77 = vector.shape_cast %76 : vector<1x1x128xf32> to vector<1x128xf32>
    %78 = arith.mulf %67, %67 : vector<224x128xf32>
    %cst_87 = arith.constant dense<0.000000e+00> : vector<128xf32>
    %79 = vector.multi_reduction <add>, %78, %cst_87 [0] : vector<224x128xf32> to vector<128xf32>
    %80 = vector.shape_cast %79 : vector<128xf32> to vector<1x128xf32>
    %81 = arith.addf %77, %80 : vector<1x128xf32>
    %c0_88 = arith.constant 0 : index
    %c0_89 = arith.constant 0 : index
    %c0_90 = arith.constant 0 : index
    %82 = vector.load %arg7[%c0_88, %c0_89, %c0_90] : memref<1x1x128xf32, #tpu.memory_space<vmem>>, vector<1x1x128xf32>
    %83 = vector.shape_cast %82 : vector<1x1x128xf32> to vector<1x128xf32>
    %84 = vector.shape_cast %81 : vector<1x128xf32> to vector<1x1x128xf32>
    tpu.vector_store %arg7[%c0_88, %c0_89, %c0_90], %84 {strides = array<i32>} : memref<1x1x128xf32, #tpu.memory_space<vmem>>, vector<1x1x128xf32>,
    %c0_91 = arith.constant 0 : index
    %c0_92 = arith.constant 0 : index
    %c0_93 = arith.constant 0 : index
    %85 = vector.load %arg5[%c0_91, %c0_92, %c0_93] : memref<1x224x128xf32, #tpu.memory_space<vmem>>, vector<1x224x128xf32>
    %86 = vector.shape_cast %85 : vector<1x224x128xf32> to vector<224x128xf32>
    %87 = vector.shape_cast %64 : vector<224x128xf32> to vector<1x224x128xf32>
    tpu.vector_store %arg5[%c0_91, %c0_92, %c0_93], %87 {strides = array<i32>} : memref<1x224x128xf32, #tpu.memory_space<vmem>>, vector<1x224x128xf32>,
    return
  }
  func.func @transform_0(%arg0: i32, %arg1: i32) -> (i32, i32, i32) {
    %c1_i32 = arith.constant 1 : i32
    %0 = arith.muli %arg0, %c1_i32 : i32
    %1 = arith.addi %0, %arg1 : i32
    %c0_i32 = arith.constant 0 : i32
    %c0_i32_0 = arith.constant 0 : i32
    %c0_i32_1 = arith.constant 0 : i32
    return %1, %c0_i32, %c0_i32_0 : i32, i32, i32
  }
  func.func @transform_1(%arg0: i32, %arg1: i32) -> (i32, i32) {
    %c0_i32 = arith.constant 0 : i32
    %c0_i32_0 = arith.constant 0 : i32
    %c0_i32_1 = arith.constant 0 : i32
    return %c0_i32, %c0_i32_0 : i32, i32
  }
  func.func @transform_2(%arg0: i32, %arg1: i32) -> (i32, i32) {
    %c0_i32 = arith.constant 0 : i32
    %c0_i32_0 = arith.constant 0 : i32
    %c0_i32_1 = arith.constant 0 : i32
    return %c0_i32, %c0_i32_0 : i32, i32
  }
  func.func @transform_3(%arg0: i32, %arg1: i32) -> (i32, i32, i32) {
    %c1_i32 = arith.constant 1 : i32
    %0 = arith.muli %arg0, %c1_i32 : i32
    %1 = arith.addi %0, %arg1 : i32
    %c0_i32 = arith.constant 0 : i32
    %c0_i32_0 = arith.constant 0 : i32
    %c0_i32_1 = arith.constant 0 : i32
    return %1, %c0_i32, %c0_i32_0 : i32, i32, i32
  }
  func.func @transform_4(%arg0: i32, %arg1: i32) -> (i32, i32, i32) {
    %c0_i32 = arith.constant 0 : i32
    %c0_i32_0 = arith.constant 0 : i32
    %c0_i32_1 = arith.constant 0 : i32
    return %arg0, %c0_i32, %c0_i32_0 : i32, i32, i32
  }
  func.func @transform_5(%arg0: i32, %arg1: i32) -> (i32, i32, i32) {
    %c0_i32 = arith.constant 0 : i32
    %c0_i32_0 = arith.constant 0 : i32
    %c0_i32_1 = arith.constant 0 : i32
    return %arg0, %c0_i32, %c0_i32_0 : i32, i32, i32
  }
}

module attributes {stable_mosaic.version = 11 : i64} {
  func.func @_bn_relu_kernel(%arg0: i32, %arg1: memref<1x224x128xf32, #tpu.memory_space<vmem>>, %arg2: memref<1x128xf32, #tpu.memory_space<vmem>>, %arg3: memref<1x128xf32, #tpu.memory_space<vmem>>, %arg4: memref<1x224x128xf32, #tpu.memory_space<vmem>>) attributes {dimension_semantics = [#tpu.dimension_semantics<parallel>], iteration_bounds = array<i64: 2>, scalar_prefetch = 0 : i64, scratch_operands = 0 : i64, tpu.core_type = #tpu.core_type<tc>, window_params = [{transform_indices = @transform_0, window_bounds = array<i64: 1, 224, 128>}, {pipeline_mode = #tpu.pipeline_mode<synchronous>, transform_indices = @transform_1, window_bounds = array<i64: 1, 128>}, {pipeline_mode = #tpu.pipeline_mode<synchronous>, transform_indices = @transform_2, window_bounds = array<i64: 1, 128>}, {transform_indices = @transform_3, window_bounds = array<i64: 1, 224, 128>}]} {
    %c0 = arith.constant 0 : index
    %c0_0 = arith.constant 0 : index
    %c0_1 = arith.constant 0 : index
    %0 = vector.load %arg1[%c0, %c0_0, %c0_1] : memref<1x224x128xf32, #tpu.memory_space<vmem>>, vector<1x224x128xf32>
    %1 = vector.shape_cast %0 : vector<1x224x128xf32> to vector<224x128xf32>
    %c0_2 = arith.constant 0 : index
    %c0_3 = arith.constant 0 : index
    %2 = vector.load %arg2[%c0_2, %c0_3] : memref<1x128xf32, #tpu.memory_space<vmem>>, vector<1x128xf32>
    %3 = vector.broadcast %2 : vector<1x128xf32> to vector<224x128xf32>
    %4 = arith.mulf %1, %3 : vector<224x128xf32>
    %c0_4 = arith.constant 0 : index
    %c0_5 = arith.constant 0 : index
    %5 = vector.load %arg3[%c0_4, %c0_5] : memref<1x128xf32, #tpu.memory_space<vmem>>, vector<1x128xf32>
    %6 = vector.broadcast %5 : vector<1x128xf32> to vector<224x128xf32>
    %7 = arith.addf %4, %6 : vector<224x128xf32>
    %cst = arith.constant 0.000000e+00 : f32
    %8 = vector.broadcast %cst : f32 to vector<224x128xf32>
    %9 = arith.maximumf %7, %8 : vector<224x128xf32>
    %c0_6 = arith.constant 0 : index
    %c0_7 = arith.constant 0 : index
    %c0_8 = arith.constant 0 : index
    %10 = vector.load %arg4[%c0_6, %c0_7, %c0_8] : memref<1x224x128xf32, #tpu.memory_space<vmem>>, vector<1x224x128xf32>
    %11 = vector.shape_cast %10 : vector<1x224x128xf32> to vector<224x128xf32>
    %12 = vector.shape_cast %9 : vector<224x128xf32> to vector<1x224x128xf32>
    tpu.vector_store %arg4[%c0_6, %c0_7, %c0_8], %12 {strides = array<i32>} : memref<1x224x128xf32, #tpu.memory_space<vmem>>, vector<1x224x128xf32>,
    return
  }
  func.func @transform_0(%arg0: i32) -> (i32, i32, i32) {
    %c0_i32 = arith.constant 0 : i32
    %c0_i32_0 = arith.constant 0 : i32
    %c0_i32_1 = arith.constant 0 : i32
    return %arg0, %c0_i32, %c0_i32_0 : i32, i32, i32
  }
  func.func @transform_1(%arg0: i32) -> (i32, i32) {
    %c0_i32 = arith.constant 0 : i32
    %c0_i32_0 = arith.constant 0 : i32
    %c0_i32_1 = arith.constant 0 : i32
    return %c0_i32, %c0_i32_0 : i32, i32
  }
  func.func @transform_2(%arg0: i32) -> (i32, i32) {
    %c0_i32 = arith.constant 0 : i32
    %c0_i32_0 = arith.constant 0 : i32
    %c0_i32_1 = arith.constant 0 : i32
    return %c0_i32, %c0_i32_0 : i32, i32
  }
  func.func @transform_3(%arg0: i32) -> (i32, i32, i32) {
    %c0_i32 = arith.constant 0 : i32
    %c0_i32_0 = arith.constant 0 : i32
    %c0_i32_1 = arith.constant 0 : i32
    return %arg0, %c0_i32, %c0_i32_0 : i32, i32, i32
  }
}

</mosaic_0001>

<bundles_post_ra>
// kernel: conv2d_bn_relu.3
= control target key start
LH: loop header
LB: loop body
LE: loop exit
PB: predicated region body
PF: predicated region fallthrough
CT: control target
= control target key end

     0   :  { %s428_s12 = smov 0   ;;  %s571_s0 = inlined_call_operand.vmem [shape: f32[2,224,128], index: 0, kind: input, shape index: {}]   ;;  %s572_s1 = inlined_call_operand.vmem [shape: f32[1,128], index: 1, kind: input, shape index: {}]   ;;  %s573_s2 = inlined_call_operand.vmem [shape: f32[1,128], index: 2, kind: input, shape index: {}]   ;;  %s574_s3 = inlined_call_operand.vmem [shape: f32[2,224,128], index: 3, kind: output, shape index: {}]  }
   0x1 LB: > { %s380_s13 = sadd.s32 4294967295, %s406_s12   ;;  %p384_p0 = scmp.ge.s32.totalorder %s406_s12, 1  ;;  %s406_s12 = sphi %s428_s12, %s13_s12  }
   0x2   : > { %p137_p1 = scmp.lt.s32.totalorder %s406_s12, 3 }
   0x4   : > { %p138_p2 = pnand %p384_p0, %p137_p1 }
   0x5   : > { %p161_p3 = scmp.lt.s32.totalorder (!%p138_p2), %s380_s13, 1  ;;  %v439_v0 = vld [vmem:[%s572_s1] ss:$0 sm:$0xff] (!%p138_p2) }
   0x6   : > { %141 = sbr.rel (%p138_p2) target bundleno = 44 (0x2c), region = 32  ;;  %v449_v1 = vld [vmem:[%s573_s2] ss:$0 sm:$0xff] (!%p138_p2) }
   0xd   : > { %s576_s13 = smov (!%p161_p3, %s380_s13), 1 }
   0xe   : > { %s391_s14 = smul.u32 224, %s576_s13 }
  0x10   : > { %s444_s19 = scalar_lea.vmem %s571_s0, %s391_s14  ;;  %s472_s24 = scalar_lea.vmem %s574_s3, %s391_s14 }
  0x11   : > { %v171_v2 = vld [vmem:[%s444_s19] sm:$0xff]  ;;  %v172_v3 = vld [vmem:[%s444_s19 + $0x8] sm:$0xff]  ;;  %v173_v4 = vld [vmem:[%s444_s19 + $0x10] sm:$0xff] }
  0x12   : > { %v206_v5 = vmul.f32 %v439_v0, %v171_v2  ;;  %v207_v6 = vmul.f32 %v439_v0, %v172_v3  ;;  %v208_v7 = vmul.f32 %v439_v0, %v173_v4  ;;  %v174_v8 = vld [vmem:[%s444_s19 + $0x18] sm:$0xff]  ;;  %v175_v9 = vld [vmem:[%s444_s19 + $0x20] sm:$0xff]  ;;  %v176_v10 = vld [vmem:[%s444_s19 + $0x28] sm:$0xff] }
  0x13   : > { %v209_v11 = vmul.f32 %v439_v0, %v174_v8  ;;  %v210_v12 = vmul.f32 %v439_v0, %v175_v9  ;;  %v211_v13 = vmul.f32 %v439_v0, %v176_v10  ;;  %v177_v14 = vld [vmem:[%s444_s19 + $0x30] sm:$0xff]  ;;  %v178_v15 = vld [vmem:[%s444_s19 + $0x38] sm:$0xff]  ;;  %v179_v24 = vld [vmem:[%s444_s19 + $0x40] sm:$0xff] }
  0x14   : > { %v241_v16 = vadd.f32 %v449_v1, %v206_v5  ;;  %v242_v17 = vadd.f32 %v449_v1, %v207_v6  ;;  %v243_v18 = vadd.f32 %v449_v1, %v208_v7  ;;  %v212_v19 = vmul.f32 %v439_v0, %v177_v14  ;;  %v180_v25 = vld [vmem:[%s444_s19 + $0x48] sm:$0xff]  ;;  %v181_v26 = vld [vmem:[%s444_s19 + $0x50] sm:$0xff]  ;;  %v182_v31 = vld [vmem:[%s444_s19 + $0x58] sm:$0xff] }
  0x15   : > { %v244_v20 = vadd.f32 %v449_v1, %v209_v11  ;;  %v245_v21 = vadd.f32 %v449_v1, %v210_v12  ;;  %v246_v22 = vadd.f32 %v449_v1, %v211_v13  ;;  %v213_v23 = vmul.f32 %v439_v0, %v178_v15  ;;  %v183_v32 = vld [vmem:[%s444_s19 + $0x60] sm:$0xff]  ;;  %v184_v33 = vld [vmem:[%s444_s19 + $0x68] sm:$0xff]  ;;  %v185_v38 = vld [vmem:[%s444_s19 + $0x70] sm:$0xff] }
  0x16   : > { %v269_v27 = vmax.f32 %v241_v16, 0.0  ;;  %v270_v28 = vmax.f32 %v242_v17, 0.0  ;;  %v271_v29 = vmax.f32 %v243_v18, 0.0  ;;  %v247_v30 = vadd.f32 %v449_v1, %v212_v19  ;;  %v186_v43 = vld [vmem:[%s444_s19 + $0x78] sm:$0xff]  ;;  %v187_v56 = vld [vmem:[%s444_s19 + $0x80] sm:$0xff]  ;;  %v188_v57 = vld [vmem:[%s444_s19 + $0x88] sm:$0xff] }
  0x17   : > { %v272_v34 = vmax.f32 %v244_v20, 0.0  ;;  %v273_v35 = vmax.f32 %v245_v21, 0.0  ;;  %v274_v36 = vmax.f32 %v246_v22, 0.0  ;;  %v248_v37 = vadd.f32 %v449_v1, %v213_v23  ;;  %v189_v58 = vld [vmem:[%s444_s19 + $0x90] sm:$0xff]  ;;  %v190_v63 = vld [vmem:[%s444_s19 + $0x98] sm:$0xff]  ;;  %v191_v2 = vld [vmem:[%s444_s19 + $0xa0] sm:$0xff] }
  0x18   : > { %297 = vst [vmem:[%s472_s24] sm:$0xff] %v269_v27  ;;  %298 = vst [vmem:[%s472_s24 + $0x8] sm:$0xff] %v270_v28  ;;  %v275_v39 = vmax.f32 %v247_v30, 0.0  ;;  %v214_v40 = vmul.f32 %v439_v0, %v179_v24  ;;  %v215_v41 = vmul.f32 %v439_v0, %v180_v25  ;;  %v216_v42 = vmul.f32 %v439_v0, %v181_v26  ;;  %v192_v3 = vld [vmem:[%s444_s19 + $0xa8] sm:$0xff]  ;;  %v193_v8 = vld [vmem:[%s444_s19 + $0xb0] sm:$0xff] }
  0x19   : > { %299 = vst [vmem:[%s472_s24 + $0x10] sm:$0xff] %v271_v29  ;;  %300 = vst [vmem:[%s472_s24 + $0x18] sm:$0xff] %v272_v34  ;;  %v276_v44 = vmax.f32 %v248_v37, 0.0  ;;  %v217_v45 = vmul.f32 %v439_v0, %v182_v31  ;;  %v218_v46 = vmul.f32 %v439_v0, %v183_v32  ;;  %v219_v47 = vmul.f32 %v439_v0, %v184_v33  ;;  %v194_v13 = vld [vmem:[%s444_s19 + $0xb8] sm:$0xff]  ;;  %v195_v26 = vld [vmem:[%s444_s19 + $0xc0] sm:$0xff] }
  0x1a   : > { %301 = vst [vmem:[%s472_s24 + $0x20] sm:$0xff] %v273_v35  ;;  %302 = vst [vmem:[%s472_s24 + $0x28] sm:$0xff] %v274_v36  ;;  %v249_v48 = vadd.f32 %v449_v1, %v214_v40  ;;  %v250_v49 = vadd.f32 %v449_v1, %v215_v41  ;;  %v251_v50 = vadd.f32 %v449_v1, %v216_v42  ;;  %v196_v27 = vld [vmem:[%s444_s19 + $0xc8] sm:$0xff]  ;;  %v197_v28 = vld [vmem:[%s444_s19 + $0xd0] sm:$0xff] }
  0x1b   : > { %303 = vst [vmem:[%s472_s24 + $0x30] sm:$0xff] %v275_v39  ;;  %v220_v51 = vmul.f32 %v439_v0, %v185_v38  ;;  %304 = vst [vmem:[%s472_s24 + $0x38] sm:$0xff] %v276_v44  ;;  %v252_v52 = vadd.f32 %v449_v1, %v217_v45  ;;  %v253_v53 = vadd.f32 %v449_v1, %v218_v46  ;;  %v198_v33 = vld [vmem:[%s444_s19 + $0xd8] sm:$0xff] }
  0x1c   : > { %v254_v54 = vadd.f32 %v449_v1, %v219_v47  ;;  %v221_v55 = vmul.f32 %v439_v0, %v186_v43  ;;  %v277_v59 = vmax.f32 %v249_v48, 0.0  ;;  %v278_v60 = vmax.f32 %v250_v49, 0.0 }
  0x1d   : > { %v279_v61 = vmax.f32 %v251_v50, 0.0  ;;  %v255_v62 = vadd.f32 %v449_v1, %v220_v51  ;;  %v280_v4 = vmax.f32 %v252_v52, 0.0  ;;  %v281_v5 = vmax.f32 %v253_v53, 0.0 }
  0x1e   : > { %v282_v6 = vmax.f32 %v254_v54, 0.0  ;;  %v256_v7 = vadd.f32 %v449_v1, %v221_v55  ;;  %305 = vst [vmem:[%s472_s24 + $0x40] sm:$0xff] %v277_v59  ;;  %306 = vst [vmem:[%s472_s24 + $0x48] sm:$0xff] %v278_v60  ;;  %v222_v10 = vmul.f32 %v439_v0, %v187_v56  ;;  %v223_v11 = vmul.f32 %v439_v0, %v188_v57 }
  0x1f   : > { %307 = vst [vmem:[%s472_s24 + $0x50] sm:$0xff] %v279_v61  ;;  %v283_v9 = vmax.f32 %v255_v62, 0.0  ;;  %v224_v12 = vmul.f32 %v439_v0, %v189_v58  ;;  %308 = vst [vmem:[%s472_s24 + $0x58] sm:$0xff] %v280_v4  ;;  %v225_v15 = vmul.f32 %v439_v0, %v190_v63  ;;  %v226_v16 = vmul.f32 %v439_v0, %v191_v2 }
  0x20   : > { %309 = vst [vmem:[%s472_s24 + $0x60] sm:$0xff] %v281_v5  ;;  %310 = vst [vmem:[%s472_s24 + $0x68] sm:$0xff] %v282_v6  ;;  %v284_v14 = vmax.f32 %v256_v7, 0.0  ;;  %v227_v17 = vmul.f32 %v439_v0, %v192_v3  ;;  %v257_v18 = vadd.f32 %v449_v1, %v222_v10  ;;  %v258_v19 = vadd.f32 %v449_v1, %v223_v11 }
  0x21   : > { %311 = vst [vmem:[%s472_s24 + $0x70] sm:$0xff] %v283_v9  ;;  %v259_v20 = vadd.f32 %v449_v1, %v224_v12  ;;  %v228_v21 = vmul.f32 %v439_v0, %v193_v8  ;;  %v260_v22 = vadd.f32 %v449_v1, %v225_v15  ;;  %v261_v23 = vadd.f32 %v449_v1, %v226_v16 }
  0x22   : > { %312 = vst [vmem:[%s472_s24 + $0x78] sm:$0xff] %v284_v14  ;;  %v262_v24 = vadd.f32 %v449_v1, %v227_v17  ;;  %v229_v25 = vmul.f32 %v439_v0, %v194_v13  ;;  %v285_v29 = vmax.f32 %v257_v18, 0.0  ;;  %v286_v30 = vmax.f32 %v258_v19, 0.0 }
  0x23   : > { %v287_v31 = vmax.f32 %v259_v20, 0.0  ;;  %v263_v32 = vadd.f32 %v449_v1, %v228_v21  ;;  %v288_v34 = vmax.f32 %v260_v22, 0.0  ;;  %v289_v35 = vmax.f32 %v261_v23, 0.0 }
  0x24   : > { %v290_v36 = vmax.f32 %v262_v24, 0.0  ;;  %v264_v37 = vadd.f32 %v449_v1, %v229_v25  ;;  %313 = vst [vmem:[%s472_s24 + $0x80] sm:$0xff] %v285_v29  ;;  %314 = vst [vmem:[%s472_s24 + $0x88] sm:$0xff] %v286_v30  ;;  %v230_v39 = vmul.f32 %v439_v0, %v195_v26  ;;  %v231_v40 = vmul.f32 %v439_v0, %v196_v27 }
  0x25   : > { %315 = vst [vmem:[%s472_s24 + $0x90] sm:$0xff] %v287_v31  ;;  %v291_v38 = vmax.f32 %v263_v32, 0.0  ;;  %v232_v41 = vmul.f32 %v439_v0, %v197_v28  ;;  %316 = vst [vmem:[%s472_s24 + $0x98] sm:$0xff] %v288_v34  ;;  %v233_v43 = vmul.f32 %v439_v0, %v198_v33 }
  0x26   : > { %317 = vst [vmem:[%s472_s24 + $0xa0] sm:$0xff] %v289_v35  ;;  %318 = vst [vmem:[%s472_s24 + $0xa8] sm:$0xff] %v290_v36  ;;  %v292_v42 = vmax.f32 %v264_v37, 0.0  ;;  %v265_v44 = vadd.f32 %v449_v1, %v230_v39  ;;  %v266_v45 = vadd.f32 %v449_v1, %v231_v40 }
  0x27   : > { %319 = vst [vmem:[%s472_s24 + $0xb0] sm:$0xff] %v291_v38  ;;  %v267_v46 = vadd.f32 %v449_v1, %v232_v41  ;;  %v268_v47 = vadd.f32 %v449_v1, %v233_v43 }
  0x28   : > { %320 = vst [vmem:[%s472_s24 + $0xb8] sm:$0xff] %v292_v42  ;;  %v293_v48 = vmax.f32 %v265_v44, 0.0  ;;  %v294_v49 = vmax.f32 %v266_v45, 0.0 }
  0x29   : > { %v295_v50 = vmax.f32 %v267_v46, 0.0  ;;  %v296_v51 = vmax.f32 %v268_v47, 0.0 }
  0x2a   : > { %321 = vst [vmem:[%s472_s24 + $0xc0] sm:$0xff] %v293_v48  ;;  %322 = vst [vmem:[%s472_s24 + $0xc8] sm:$0xff] %v294_v49 }
  0x2b   : > { %323 = vst [vmem:[%s472_s24 + $0xd0] sm:$0xff] %v295_v50  ;;  %324 = vst [vmem:[%s472_s24 + $0xd8] sm:$0xff] %v296_v51 }
  0x2c PF: > { %s13_s12 = sadd.s32 1, %s406_s12  }
  0x2d   : > { %p10_p4 = scmp.ge.s32.totalorder %s13_s12, 4  }
  0x2f   :  { %12 = sbr.rel (!%p10_p4) target bundleno = 1 (0x1), region = 62 }

// kernel: conv2d_bn_relu.2
= control target key start
LH: loop header
LB: loop body
LE: loop exit
PB: predicated region body
PF: predicated region fallthrough
CT: control target
= control target key end

     0   :  { %s5534_s18 = smov 0   ;;  %s5536_s19 = smov 0   ;;  %s6565_s0 = inlined_call_operand.vmem [shape: f32[2,264,8], index: 0, kind: input, shape index: {}]   ;;  %s6566_s1 = inlined_call_operand.vmem [shape: f32[72,128], index: 1, kind: input, shape index: {}]   ;;  %s6567_s2 = inlined_call_operand.vmem [shape: f32[224,1], index: 2, kind: input, shape index: {}]   ;;  %s6568_s3 = inlined_call_operand.vmem [shape: f32[2,224,128], index: 3, kind: output, shape index: {0}]   ;;  %s6569_s4 = inlined_call_operand.vmem [shape: f32[2,1,128], index: 4, kind: output, shape index: {1}]   ;;  %s6570_s5 = inlined_call_operand.vmem [shape: f32[2,1,128], index: 5, kind: output, shape index: {2}]  }
   0x1   :  { %s5538_s20 = smov 0  }
   0x2 LB: > { %s28_s21 = sadd.s32 1, %s5496_s19  ;;  %p4308_p0 = scmp.ge.s32.totalorder %s5500_s20, 1  ;;  %s5500_s20 = sphi %s5538_s20, %s16_s20   ;;  %s5496_s19 = sphi %s5536_s19, %s6647_s19   ;;  %s5492_s18 = sphi %s5534_s18, %s6646_s18  }
   0x3   : > { %p30_p1 = scmp.ge.s32.totalorder %s28_s21, 2  ;;  %p210_p2 = scmp.lt.s32.totalorder %s5500_s20, 3 }
   0x5   : > { %s6649_s21 = smov (%p30_p1, %s28_s21), 0  ;;  %p211_p3 = pnand %p4308_p0, %p210_p2 }
   0x7   : > { %214 = sbr.rel (%p211_p3) target bundleno = 508 (0x1fc), region = 32 }
   0xe   : > { %v300_v0 = vld [vmem:[%s6566_s1] sm:$0xff]  ;;  %p247_p4 = scmp.lt.s32.totalorder %s5492_s18, 1  ;;  %v647_v2 = vld [vmem:[%s6566_s1 + $0x8] sm:$0xff]  ;;  %vm301_vm0 = vcmask 64512   ;;  %v5599_v10 = vld [vmem:[%s6566_s1 + $0x30] sm:$0xff] }
   0xf   : > { %v5558_v1 = vld [vmem:[%s6566_s1 + $0x20] sm:$0xff]  ;;  %4826 = vmatprep.subr.mxu1 %v300_v0  ;;  %v2255_v3 = vld [vmem:[%s6566_s1 + $0x28] sm:$0xff]  ;;  %v5604_v11 = vld [vmem:[%s6566_s1 + $0x10] sm:$0xff] }
  0x10   : > { %5002 = vmatprep.subr.mxu0 %v5558_v1  ;;  %4827 = vmatpush3.msra.mxu1 %v300_v0  ;;  %s6651_s18 = smov (!%p247_p4, %s5492_s18), 1  ;;  %v5747_v40 = vld [vmem:[%s6566_s1 + $0x38] sm:$0xff] }
  0x11   : > { %5003 = vmatpush3.msra.mxu0 %v5558_v1  ;;  %4870 = vmatprep.subr.mxu1 %v647_v2  ;;  %s5448_s30 = smul.u32 264, %s6651_s18  ;;  %s6457_s17 = scalar_lea.vmem %s6569_s4, %s6651_s18 }
  0x12   : > { %5046 = vmatprep.subr.mxu0 %v2255_v3  ;;  %s6463_s24 = scalar_lea.vmem %s6570_s5, %s6651_s18 }
  0x13   : > { %s5574_s8 = scalar_lea.vmem %s6565_s0, %s5448_s30 }
  0x14   : > { %v272_v4 = vld [vmem:[%s5574_s8] sm:$0xff]  ;;  %v5578_v5 = vld [vmem:[%s5574_s8 + $0x11] sm:$0xff]  ;;  %v273_v6 = vld [vmem:[%s5574_s8 + $0x8] sm:$0xff] }
  0x15   : > { %4828 = vmatprep.mubr.msk.f32.mxu1 %vm301_vm0, %v272_v4  ;;  %5004 = vmatprep.mubr.msk.f32.mxu0 %vm301_vm0, %v5578_v5  ;;  %v5585_v7 = vld [vmem:[%s5574_s8 + $0x19] sm:$0xff]  ;;  %v5588_v8 = vld [vmem:[%s5574_s8 + $0x10] sm:$0xff]  ;;  %v5591_v9 = vld [vmem:[%s5574_s8 + $0x21] sm:$0xff] }
  0x16   : > { %6600 = vst [vmem:[#allocation3_spill] sm:$0xff] %v5588_v8  ;;  %4829 = vmatmul.mubr.msk.f32.vlgmr.msra.gmra.mrb[0].mxu1 %vm301_vm0, %v273_v6  ;;  %5005 = vmatmul.mubr.msk.f32.vlgmr.msra.gmra.mrb[0].mxu0 %vm301_vm0, %v5585_v7  ;;  %v5607_v12 = vld [vmem:[%s5574_s8 + $0x18] sm:$0xff]  ;;  %v5610_v13 = vld [vmem:[%s5574_s8 + $0x29] sm:$0xff]  ;;  %v5617_v14 = vld [vmem:[%s5574_s8 + $0x20] sm:$0xff] }
  0x17   : > { %4871 = vmatpush3.msra.mxu1 %v647_v2  ;;  %5047 = vmatpush3.msra.mxu0 %v2255_v3  ;;  %6601 = vst [vmem:[#allocation4_spill] sm:$0xff] %v5607_v12  ;;  %6602 = vst [vmem:[#allocation5_spill] sm:$0xff] %v5617_v14  ;;  %v5620_v15 = vld [vmem:[%s5574_s8 + $0x31] sm:$0xff]  ;;  %v5633_v16 = vld [vmem:[%s5574_s8 + $0x28] sm:$0xff] }
  0x18   : > { %4831 = vmatprep.mubr.msk.f32.mxu1 %vm301_vm0, %v5588_v8  ;;  %5007 = vmatprep.mubr.msk.f32.mxu0 %vm301_vm0, %v5591_v9  ;;  %6603 = vst [vmem:[#allocation6_spill] sm:$0xff] %v5633_v16  ;;  %v5636_v17 = vld [vmem:[%s5574_s8 + $0x39] sm:$0xff]  ;;  %v5639_v18 = vld [vmem:[%s5574_s8 + $0x30] sm:$0xff]  ;;  %v5642_v19 = vld [vmem:[%s5574_s8 + $0x41] sm:$0xff] }
  0x19   : > { %5090 = vmatprep.subr.mxu0 %v5599_v10  ;;  %4914 = vmatprep.subr.mxu1 %v5604_v11  ;;  %6604 = vst [vmem:[#allocation7_spill] sm:$0xff] %v5639_v18  ;;  %v5653_v20 = vld [vmem:[%s5574_s8 + $0x38] sm:$0xff]  ;;  %v5656_v21 = vld [vmem:[%s5574_s8 + $0x49] sm:$0xff]  ;;  %v5659_v22 = vld [vmem:[%s5574_s8 + $0x40] sm:$0xff] }
  0x1a   : > { %4832 = vmatmul.mubr.msk.f32.gmra.mrb[2].mxu1 %vm301_vm0, %v5607_v12  ;;  %5008 = vmatmul.mubr.msk.f32.gmra.mrb[2].mxu0 %vm301_vm0, %v5610_v13  ;;  %6605 = vst [vmem:[#allocation8_spill] sm:$0xff] %v5653_v20  ;;  %6606 = vst [vmem:[#allocation9_spill] sm:$0xff] %v5659_v22  ;;  %v5662_v23 = vld [vmem:[%s5574_s8 + $0x51] sm:$0xff]  ;;  %v5673_v24 = vld [vmem:[%s5574_s8 + $0x48] sm:$0xff] }
  0x1b   : > { %4834 = vmatprep.mubr.msk.f32.mxu1 %vm301_vm0, %v5617_v14  ;;  %5010 = vmatprep.mubr.msk.f32.mxu0 %vm301_vm0, %v5620_v15  ;;  %6607 = vst [vmem:[#allocation10_spill] sm:$0xff] %v5673_v24  ;;  %v5676_v25 = vld [vmem:[%s5574_s8 + $0x59] sm:$0xff]  ;;  %v5679_v26 = vld [vmem:[%s5574_s8 + $0x50] sm:$0xff]  ;;  %v5682_v27 = vld [vmem:[%s5574_s8 + $0x61] sm:$0xff] }
  0x1c   : > { %6608 = vst [vmem:[#allocation11_spill] sm:$0xff] %v5679_v26  ;;  %v5693_v28 = vld [vmem:[%s5574_s8 + $0x58] sm:$0xff]  ;;  %v5696_v29 = vld [vmem:[%s5574_s8 + $0x69] sm:$0xff]  ;;  %v5699_v30 = vld [vmem:[%s5574_s8 + $0x60] sm:$0xff] }
  0x1d   : > { %6609 = vst [vmem:[#allocation12_spill] sm:$0xff] %v5693_v28  ;;  %6610 = vst [vmem:[#allocation13_spill] sm:$0xff] %v5699_v30  ;;  %v5702_v31 = vld [vmem:[%s5574_s8 + $0x71] sm:$0xff]  ;;  %v5713_v32 = vld [vmem:[%s5574_s8 + $0x68] sm:$0xff] }
  0x1e   : > { %4835 = vmatmul.mubr.msk.f32.gmra.mrb[4].mxu1 %vm301_vm0, %v5633_v16  ;;  %5011 = vmatmul.mubr.msk.f32.gmra.mrb[4].mxu0 %vm301_vm0, %v5636_v17  ;;  %6611 = vst [vmem:[#allocation14_spill] sm:$0xff] %v5713_v32  ;;  %v5716_v33 = vld [vmem:[%s5574_s8 + $0x79] sm:$0xff]  ;;  %v5719_v34 = vld [vmem:[%s5574_s8 + $0x70] sm:$0xff]  ;;  %v5742_v39 = vld [vmem:[%s5574_s8 + $0x22] sm:$0xff] }
  0x1f   : > { %4837 = vmatprep.mubr.msk.f32.mxu1 %vm301_vm0, %v5639_v18  ;;  %5013 = vmatprep.mubr.msk.f32.mxu0 %vm301_vm0, %v5642_v19  ;;  %6612 = vst [vmem:[#allocation15_spill] sm:$0xff] %v5719_v34  ;;  %v5722_v35 = vld [vmem:[%s5574_s8 + $0x12] sm:$0xff]  ;;  %v5736_v37 = vld [vmem:[%s5574_s8 + $0x1a] sm:$0xff]  ;;  %v5757_v41 = vld [vmem:[%s5574_s8 + $0x88] sm:$0xff] }
  0x20   : > { %v5733_v36 = vld [vmem:[%s5574_s8 + $0x78] sm:$0xff]  ;;  %v5739_v38 = vld [vmem:[%s5574_s8 + $0x80] sm:$0xff]  ;;  %6614 = vst [vmem:[#allocation17_spill] sm:$0xff] %v5757_v41  ;;  %v5760_v42 = vld [vmem:[%s5574_s8 + $0x2a] sm:$0xff] }
  0x21   : > { %6613 = vst [vmem:[#allocation16_spill] sm:$0xff] %v5733_v36  ;;  %v5765_v43 = vld [vmem:[%s5574_s8 + $0x90] sm:$0xff]  ;;  %v5780_v45 = vld [vmem:[%s5574_s8 + $0x98] sm:$0xff]  ;;  %v5786_v47 = vld [vmem:[%s5574_s8 + $0xa0] sm:$0xff] }
  0x22   : > { %4838 = vmatmul.mubr.msk.f32.gmra.mrb[6].mxu1 %vm301_vm0, %v5653_v20  ;;  %5014 = vmatmul.mubr.msk.f32.gmra.mrb[6].mxu0 %vm301_vm0, %v5656_v21  ;;  %v5768_v44 = vld [vmem:[%s5574_s8 + $0x32] sm:$0xff]  ;;  %v5783_v46 = vld [vmem:[%s5574_s8 + $0x3a] sm:$0xff]  ;;  %v5789_v48 = vld [vmem:[%s5574_s8 + $0x42] sm:$0xff] }
  0x23   : > { %4840 = vmatprep.mubr.msk.f32.mxu1 %vm301_vm0, %v5659_v22  ;;  %5016 = vmatprep.mubr.msk.f32.mxu0 %vm301_vm0, %v5662_v23  ;;  %v5800_v49 = vld [vmem:[%s5574_s8 + $0xa8] sm:$0xff]  ;;  %v5806_v51 = vld [vmem:[%s5574_s8 + $0xb0] sm:$0xff]  ;;  %v5820_v53 = vld [vmem:[%s5574_s8 + $0xb8] sm:$0xff] }
  0x24   : > { %v5803_v50 = vld [vmem:[%s5574_s8 + $0x4a] sm:$0xff]  ;;  %v5809_v52 = vld [vmem:[%s5574_s8 + $0x52] sm:$0xff]  ;;  %v5823_v54 = vld [vmem:[%s5574_s8 + $0x5a] sm:$0xff] }
  0x25   : > { %v5826_v55 = vld [vmem:[%s5574_s8 + $0xc0] sm:$0xff]  ;;  %v5840_v57 = vld [vmem:[%s5574_s8 + $0xc8] sm:$0xff]  ;;  %v5846_v59 = vld [vmem:[%s5574_s8 + $0xd0] sm:$0xff] }
  0x26   : > { %4841 = vmatmul.mubr.msk.f32.gmra.mrb[8].mxu1 %vm301_vm0, %v5673_v24  ;;  %5017 = vmatmul.mubr.msk.f32.gmra.mrb[8].mxu0 %vm301_vm0, %v5676_v25  ;;  %v5829_v56 = vld [vmem:[%s5574_s8 + $0x62] sm:$0xff]  ;;  %v5843_v58 = vld [vmem:[%s5574_s8 + $0x6a] sm:$0xff]  ;;  %v5849_v60 = vld [vmem:[%s5574_s8 + $0x72] sm:$0xff] }
  0x27   : > { %4843 = vmatprep.mubr.msk.f32.mxu1 %vm301_vm0, %v5679_v26  ;;  %5019 = vmatprep.mubr.msk.f32.mxu0 %vm301_vm0, %v5682_v27  ;;  %v5860_v61 = vld [vmem:[%s5574_s8 + $0xd8] sm:$0xff]  ;;  %v619_v63 = vld [vmem:[%s5574_s8 + $0x1] sm:$0xff]  ;;  %v620_v2 = vld [vmem:[%s5574_s8 + $0x9] sm:$0xff] }
  0x28   : > { %v5863_v62 = vld [vmem:[%s5574_s8 + $0x7a] sm:$0xff]  ;;  %v5867_v0 = vld [vmem:[%s5574_s8 + $0x82] sm:$0xff]  ;;  %v5878_v3 = vld [vmem:[%s5574_s8 + $0x8a] sm:$0xff] }
  0x29   : > { %v5881_v4 = vld [vmem:[%s5574_s8 + $0x92] sm:$0xff]  ;;  %v5940_v12 = vld [vmem:[%s5574_s8 + $0xca] sm:$0xff] }
  0x2a   : > { %4844 = vmatmul.mubr.msk.f32.gmra.mrb[10].mxu1 %vm301_vm0, %v5693_v28  ;;  %5020 = vmatmul.mubr.msk.f32.gmra.mrb[10].mxu0 %vm301_vm0, %v5696_v29  ;;  %v5886_v6 = vld [vmem:[%s6566_s1 + $0x18] sm:$0xff]  ;;  %6617 = vst [vmem:[#allocation20_spill] sm:$0xff] %v5940_v12 }
  0x2b   : > { %4846 = vmatprep.mubr.msk.f32.mxu1 %vm301_vm0, %v5699_v30  ;;  %5022 = vmatprep.mubr.msk.f32.mxu0 %vm301_vm0, %v5702_v31  ;;  %v5943_v8 = vld [vmem:[%s5574_s8 + $0xd2] sm:$0xff] }
  0x2e   : > { %4847 = vmatmul.mubr.msk.f32.gmra.mrb[12].mxu1 %vm301_vm0, %v5713_v32  ;;  %5023 = vmatmul.mubr.msk.f32.gmra.mrb[12].mxu0 %vm301_vm0, %v5716_v33 }
  0x2f   : > { %4849 = vmatprep.mubr.msk.f32.mxu1 %vm301_vm0, %v5719_v34  ;;  %5048 = vmatprep.mubr.msk.f32.mxu0 %vm301_vm0, %v5722_v35 }
  0x32   : > { %4850 = vmatmul.mubr.msk.f32.gmra.mrb[14].mxu1 %vm301_vm0, %v5733_v36  ;;  %5049 = vmatmul.mubr.msk.f32.vlgmr.msra.gmra.mrb[0].mxu0 %vm301_vm0, %v5736_v37 }
  0x33   : > { %5091 = vmatpush3.msra.mxu0 %v5599_v10  ;;  %4852 = vmatprep.mubr.msk.f32.mxu1 %vm301_vm0, %v5739_v38  ;;  %v5895_v10 = vld [vmem:[%s5574_s8 + $0x9a] sm:$0xff] }
  0x34   : > { %5051 = vmatprep.mubr.msk.f32.mxu0 %vm301_vm0, %v5742_v39  ;;  %5134 = vmatprep.subr.mxu0 %v5747_v40 }
  0x36   : > { %4853 = vmatmul.mubr.msk.f32.gmra.mrb[16].mxu1 %vm301_vm0, %v5757_v41  ;;  %5052 = vmatmul.mubr.msk.f32.gmra.mrb[2].mxu0 %vm301_vm0, %v5760_v42 }
  0x37   : > { %4855 = vmatprep.mubr.msk.f32.mxu1 %vm301_vm0, %v5765_v43  ;;  %5054 = vmatprep.mubr.msk.f32.mxu0 %vm301_vm0, %v5768_v44 }
  0x3a   : > { %4856 = vmatmul.mubr.msk.f32.gmra.mrb[18].mxu1 %vm301_vm0, %v5780_v45  ;;  %5055 = vmatmul.mubr.msk.f32.gmra.mrb[4].mxu0 %vm301_vm0, %v5783_v46 }
  0x3b   : > { %4858 = vmatprep.mubr.msk.f32.mxu1 %vm301_vm0, %v5786_v47  ;;  %5057 = vmatprep.mubr.msk.f32.mxu0 %vm301_vm0, %v5789_v48 }
  0x3e   : > { %4859 = vmatmul.mubr.msk.f32.gmra.mrb[20].mxu1 %vm301_vm0, %v5800_v49  ;;  %5058 = vmatmul.mubr.msk.f32.gmra.mrb[6].mxu0 %vm301_vm0, %v5803_v50 }
  0x3f   : > { %4861 = vmatprep.mubr.msk.f32.mxu1 %vm301_vm0, %v5806_v51  ;;  %5060 = vmatprep.mubr.msk.f32.mxu0 %vm301_vm0, %v5809_v52 }
  0x42   : > { %4862 = vmatmul.mubr.msk.f32.gmra.mrb[22].mxu1 %vm301_vm0, %v5820_v53  ;;  %5061 = vmatmul.mubr.msk.f32.gmra.mrb[8].mxu0 %vm301_vm0, %v5823_v54 }
  0x43   : > { %4864 = vmatprep.mubr.msk.f32.mxu1 %vm301_vm0, %v5826_v55  ;;  %5063 = vmatprep.mubr.msk.f32.mxu0 %vm301_vm0, %v5829_v56 }
  0x46   : > { %4865 = vmatmul.mubr.msk.f32.gmra.mrb[24].mxu1 %vm301_vm0, %v5840_v57  ;;  %5064 = vmatmul.mubr.msk.f32.gmra.mrb[10].mxu0 %vm301_vm0, %v5843_v58 }
  0x47   : > { %4867 = vmatprep.mubr.msk.f32.mxu1 %vm301_vm0, %v5846_v59  ;;  %5066 = vmatprep.mubr.msk.f32.mxu0 %vm301_vm0, %v5849_v60 }
  0x4a   : > { %4868 = vmatmul.mubr.msk.f32.gmra.mrb[26].mxu1 %vm301_vm0, %v5860_v61  ;;  %5067 = vmatmul.mubr.msk.f32.gmra.mrb[12].mxu0 %vm301_vm0, %v5863_v62 }
  0x4b   : > { %4872 = vmatprep.mubr.msk.f32.mxu1 %vm301_vm0, %v619_v63  ;;  %5069 = vmatprep.mubr.msk.f32.mxu0 %vm301_vm0, %v5867_v0  ;;  %v5900_v63 = vld [vmem:[%s5574_s8 + $0xa2] sm:$0xff] }
  0x4e   : > { %4873 = vmatmul.mubr.msk.f32.vlgmr.msra.gmra.mrb[0].mxu1 %vm301_vm0, %v620_v2  ;;  %5070 = vmatmul.mubr.msk.f32.gmra.mrb[14].mxu0 %vm301_vm0, %v5878_v3  ;;  %v5929_v2 = vld [vmem:[%s5574_s8 + $0xc2] sm:$0xff] }
  0x4f   : > { %4915 = vmatpush3.msra.mxu1 %v5604_v11  ;;  %4875 = vmatprep.mubr.msk.f32.mxu1 %vm301_vm0, %v5578_v5  ;;  %v5912_v5 = vld [vmem:[%s5574_s8 + $0xaa] sm:$0xff]  ;;  %v5915_v11 = vld [vmem:[%s5574_s8 + $0xb2] sm:$0xff]  ;;  %6616 = vst [vmem:[#allocation19_spill] sm:$0xff] %v5929_v2 }
  0x50   : > { %5072 = vmatprep.mubr.msk.f32.mxu0 %vm301_vm0, %v5881_v4  ;;  %4958 = vmatprep.subr.mxu1 %v5886_v6 }
  0x52   : > { %4876 = vmatmul.mubr.msk.f32.gmra.mrb[2].mxu1 %vm301_vm0, %v5585_v7  ;;  %5073 = vmatmul.mubr.msk.f32.gmra.mrb[16].mxu0 %vm301_vm0, %v5895_v10  ;;  %v5926_v7 = vld [vmem:[%s5574_s8 + $0xba] sm:$0xff] }
  0x53   : > { %4878 = vmatprep.mubr.msk.f32.mxu1 %vm301_vm0, %v5591_v9  ;;  %5075 = vmatprep.mubr.msk.f32.mxu0 %vm301_vm0, %v5900_v63  ;;  %6615 = vst [vmem:[#allocation18_spill] sm:$0xff] %v5926_v7 }
  0x56   : > { %4879 = vmatmul.mubr.msk.f32.gmra.mrb[4].mxu1 %vm301_vm0, %v5610_v13  ;;  %5076 = vmatmul.mubr.msk.f32.gmra.mrb[18].mxu0 %vm301_vm0, %v5912_v5 }
  0x57   : > { %4881 = vmatprep.mubr.msk.f32.mxu1 %vm301_vm0, %v5620_v15  ;;  %5078 = vmatprep.mubr.msk.f32.mxu0 %vm301_vm0, %v5915_v11 }
  0x5a   : > { %4882 = vmatmul.mubr.msk.f32.gmra.mrb[6].mxu1 %vm301_vm0, %v5636_v17  ;;  %5079 = vmatmul.mubr.msk.f32.gmra.mrb[20].mxu0 %vm301_vm0, %v5926_v7  ;;  %v5954_v7 = vld [vmem:[%s5574_s8 + $0xda] sm:$0xff] }
  0x5b   : > { %4884 = vmatprep.mubr.msk.f32.mxu1 %vm301_vm0, %v5642_v19  ;;  %5081 = vmatprep.mubr.msk.f32.mxu0 %vm301_vm0, %v5929_v2  ;;  %6618 = vst [vmem:[#allocation21_spill] sm:$0xff] %v5954_v7  ;;  %v5957_v2 = vld [vmem:[%s5574_s8 + $0xe2] sm:$0xff] }
  0x5c   : > { %6619 = vst [vmem:[#allocation22_spill] sm:$0xff] %v5957_v2 }
  0x5e   : > { %4885 = vmatmul.mubr.msk.f32.gmra.mrb[8].mxu1 %vm301_vm0, %v5656_v21  ;;  %5082 = vmatmul.mubr.msk.f32.gmra.mrb[22].mxu0 %vm301_vm0, %v5940_v12  ;;  %v5968_v12 = vld [vmem:[%s5574_s8 + $0xea] sm:$0xff] }
  0x5f   : > { %4887 = vmatprep.mubr.msk.f32.mxu1 %vm301_vm0, %v5662_v23  ;;  %5084 = vmatprep.mubr.msk.f32.mxu0 %vm301_vm0, %v5943_v8  ;;  %6620 = vst [vmem:[#allocation23_spill] sm:$0xff] %v5968_v12 }
  0x62   : > { %4888 = vmatmul.mubr.msk.f32.gmra.mrb[10].mxu1 %vm301_vm0, %v5676_v25  ;;  %5085 = vmatmul.mubr.msk.f32.gmra.mrb[24].mxu0 %vm301_vm0, %v5954_v7  ;;  %v5979_v7 = vld [vmem:[%s5574_s8 + $0x81] sm:$0xff] }
  0x63   : > { %4890 = vmatprep.mubr.msk.f32.mxu1 %vm301_vm0, %v5682_v27  ;;  %5087 = vmatprep.mubr.msk.f32.mxu0 %vm301_vm0, %v5957_v2  ;;  %v5984_v2 = vld [vmem:[%s6566_s1 + $0x40] sm:$0xff] }
  0x66   : > { %4891 = vmatmul.mubr.msk.f32.gmra.mrb[12].mxu1 %vm301_vm0, %v5696_v29  ;;  %5088 = vmatmul.mubr.msk.f32.gmra.mrb[26].mxu0 %vm301_vm0, %v5968_v12  ;;  %v5994_v12 = vld [vmem:[%s5574_s8 + $0x89] sm:$0xff] }
  0x67   : > { %4893 = vmatprep.mubr.msk.f32.mxu1 %vm301_vm0, %v5702_v31  ;;  %5092 = vmatprep.mubr.msk.f32.mxu0 %vm301_vm0, %v5617_v14  ;;  %v5999_v14 = vld [vmem:[%s5574_s8 + $0x91] sm:$0xff] }
  0x6a   : > { %4894 = vmatmul.mubr.msk.f32.gmra.mrb[14].mxu1 %vm301_vm0, %v5716_v33  ;;  %5093 = vmatmul.mubr.msk.f32.vlgmr.msra.gmra.mrb[0].mxu0 %vm301_vm0, %v5633_v16  ;;  %v5502_v16 = vmov 0  }
  0x6b   : > { %5135 = vmatpush3.msra.mxu0 %v5747_v40  ;;  %4896 = vmatprep.mubr.msk.f32.mxu1 %vm301_vm0, %v5979_v7  ;;  %v6011_v40 = vld [vmem:[%s5574_s8 + $0x99] sm:$0xff] }
  0x6c   : > { %5095 = vmatprep.mubr.msk.f32.mxu0 %vm301_vm0, %v5639_v18  ;;  %5178 = vmatprep.subr.mxu0 %v5984_v2  ;;  %v6014_v18 = vld [vmem:[%s5574_s8 + $0xa1] sm:$0xff] }
  0x6d   : > { %5476 = vset.pattern.permute.xlu0 %v5502_v16  ;;  %5477 = vset.pattern.permute.xlu1 %v5502_v16  ;;  %v6059_v16 = vld [vmem:[%s5574_s8 + $0xd1] sm:$0xff] }
  0x6e   : > { %4897 = vmatmul.mubr.msk.f32.gmra.mrb[16].mxu1 %vm301_vm0, %v5994_v12  ;;  %5096 = vmatmul.mubr.msk.f32.gmra.mrb[2].mxu0 %vm301_vm0, %v5653_v20  ;;  %v6025_v20 = vld [vmem:[%s5574_s8 + $0xa9] sm:$0xff]  ;;  %6622 = vst [vmem:[#allocation25_spill] sm:$0xff] %v6059_v16 }
  0x6f   : > { %4899 = vmatprep.mubr.msk.f32.mxu1 %vm301_vm0, %v5999_v14  ;;  %5098 = vmatprep.mubr.msk.f32.mxu0 %vm301_vm0, %v5659_v22  ;;  %v6028_v22 = vld [vmem:[%s5574_s8 + $0xb1] sm:$0xff] }
  0x72   : > { %4900 = vmatmul.mubr.msk.f32.gmra.mrb[18].mxu1 %vm301_vm0, %v6011_v40  ;;  %5099 = vmatmul.mubr.msk.f32.gmra.mrb[4].mxu0 %vm301_vm0, %v5673_v24  ;;  %v6039_v24 = vld [vmem:[%s5574_s8 + $0xb9] sm:$0xff] }
  0x73   : > { %4902 = vmatprep.mubr.msk.f32.mxu1 %vm301_vm0, %v6014_v18  ;;  %5101 = vmatprep.mubr.msk.f32.mxu0 %vm301_vm0, %v5679_v26  ;;  %v6042_v26 = vld [vmem:[%s5574_s8 + $0xc1] sm:$0xff] }
  0x76   : > { %4903 = vmatmul.mubr.msk.f32.gmra.mrb[20].mxu1 %vm301_vm0, %v6025_v20  ;;  %5102 = vmatmul.mubr.msk.f32.gmra.mrb[6].mxu0 %vm301_vm0, %v5693_v28  ;;  %v3863_v28 = vld [vmem:[%s6567_s2] sm:$0xff] }
  0x77   : > { %4905 = vmatprep.mubr.msk.f32.mxu1 %vm301_vm0, %v6028_v22  ;;  %5104 = vmatprep.mubr.msk.f32.mxu0 %vm301_vm0, %v5699_v30  ;;  %v6056_v30 = vld [vmem:[%s5574_s8 + $0xc9] sm:$0xff] }
  0x78   : > { %6621 = vst [vmem:[#allocation24_spill] sm:$0xff] %v6056_v30  ;;  %3893 = vperm.xlu0 %5476, %v3863_v28   ;;  %v6076_v28 = vld [vmem:[%s5574_s8 + $0xd9] sm:$0xff] }
  0x7a   : > { %4906 = vmatmul.mubr.msk.f32.gmra.mrb[22].mxu1 %vm301_vm0, %v6039_v24  ;;  %5105 = vmatmul.mubr.msk.f32.gmra.mrb[8].mxu0 %vm301_vm0, %v5713_v32  ;;  %v3865_v32 = vld [vmem:[%s6567_s2 + $0x10] sm:$0xff] }
  0x7b   : > { %4908 = vmatprep.mubr.msk.f32.mxu1 %vm301_vm0, %v6042_v26  ;;  %5107 = vmatprep.mubr.msk.f32.mxu0 %vm301_vm0, %v5719_v34  ;;  %v3864_v34 = vld [vmem:[%s6567_s2 + $0x8] sm:$0xff] }
  0x7c   : > { %3903 = vperm.xlu1 %5477, %v3865_v32   ;;  %3898 = vperm.xlu0 %5476, %v3864_v34   ;;  %v1022_v32 = vld [vmem:[%s5574_s8 + $0xa] sm:$0xff] }
  0x7d   : > { %v3868_v34 = vld [vmem:[%s6567_s2 + $0x28] sm:$0xff] }
  0x7e   : > { %4909 = vmatmul.mubr.msk.f32.gmra.mrb[24].mxu1 %vm301_vm0, %v6056_v30  ;;  %5108 = vmatmul.mubr.msk.f32.gmra.mrb[10].mxu0 %vm301_vm0, %v5733_v36  ;;  %v1021_v30 = vld [vmem:[%s5574_s8 + $0x2] sm:$0xff]  ;;  %v3866_v36 = vld [vmem:[%s6567_s2 + $0x18] sm:$0xff] }
  0x7f   : > { %4911 = vmatprep.mubr.msk.f32.mxu1 %vm301_vm0, %v6059_v16  ;;  %5110 = vmatprep.mubr.msk.f32.mxu0 %vm301_vm0, %v5739_v38  ;;  %v3867_v16 = vld [vmem:[%s6567_s2 + $0x20] sm:$0xff] }
  0x80   : > { %3908 = vperm.xlu1 %5477, %v3866_v36   ;;  %3913 = vperm.xlu0 %5476, %v3867_v16   ;;  %v3872_v36 = vld [vmem:[%s6567_s2 + $0x48] sm:$0xff]  ;;  %v6151_v16 = vld [vmem:[%s5574_s8 + $0xe0] sm:$0xff] }
  0x82   : > { %4912 = vmatmul.mubr.msk.f32.gmra.mrb[26].mxu1 %vm301_vm0, %v6076_v28  ;;  %5111 = vmatmul.mubr.msk.f32.gmra.mrb[12].mxu0 %vm301_vm0, %v5757_v41  ;;  %v3869_v41 = vld [vmem:[%s6567_s2 + $0x30] sm:$0xff] }
  0x83   : > { %4916 = vmatprep.mubr.msk.f32.mxu1 %vm301_vm0, %v1021_v30  ;;  %5113 = vmatprep.mubr.msk.f32.mxu0 %vm301_vm0, %v5765_v43  ;;  %v3870_v30 = vld [vmem:[%s6567_s2 + $0x38] sm:$0xff] }
  0x84   : > { %3918 = vperm.xlu1 %5477, %v3868_v34   ;;  %3923 = vperm.xlu0 %5476, %v3869_v41   ;;  %v3874_v41 = vld [vmem:[%s6567_s2 + $0x58] sm:$0xff]  ;;  %v3877_v34 = vld [vmem:[%s6567_s2 + $0x70] sm:$0xff] }
  0x86   : > { %4917 = vmatmul.mubr.msk.f32.vlgmr.msra.gmra.mrb[0].mxu1 %vm301_vm0, %v1022_v32  ;;  %5114 = vmatmul.mubr.msk.f32.gmra.mrb[14].mxu0 %vm301_vm0, %v5780_v45  ;;  %v3876_v32 = vld [vmem:[%s6567_s2 + $0x68] sm:$0xff] }
  0x87   : > { %4959 = vmatpush3.msra.mxu1 %v5886_v6  ;;  %4919 = vmatprep.mubr.msk.f32.mxu1 %vm301_vm0, %v5722_v35  ;;  %v3871_v35 = vld [vmem:[%s6567_s2 + $0x40] sm:$0xff] }
  0x88   : > { %5116 = vmatprep.mubr.msk.f32.mxu0 %vm301_vm0, %v5786_v47  ;;  %5222 = vmatprep.subr.mxu1 %v5558_v1  ;;  %v3875_v6 = vld [vmem:[%s6567_s2 + $0x60] sm:$0xff] }
  0x89   : > { %3928 = vperm.xlu1 %5477, %v3870_v30   ;;  %3933 = vperm.xlu0 %5476, %v3871_v35   ;;  %v6168_v30 = vld [vmem:[%s5574_s8 + $0xe8] sm:$0xff]  ;;  %v2655_v35 = vld [vmem:[%s5574_s8 + $0xf0] sm:$0xff] }
  0x8a   : > { %4920 = vmatmul.mubr.msk.f32.gmra.mrb[2].mxu1 %vm301_vm0, %v5736_v37  ;;  %5117 = vmatmul.mubr.msk.f32.gmra.mrb[16].mxu0 %vm301_vm0, %v5800_v49  ;;  %v3873_v37 = vld [vmem:[%s6567_s2 + $0x50] sm:$0xff] }
  0x8b   : > { %4922 = vmatprep.mubr.msk.f32.mxu1 %vm301_vm0, %v5742_v39  ;;  %5119 = vmatprep.mubr.msk.f32.mxu0 %vm301_vm0, %v5806_v51 }
  0x8d   : > { %3938 = vperm.xlu1 %5477, %v3872_v36   ;;  %3943 = vperm.xlu0 %5476, %v3873_v37   ;;  %v3878_v36 = vld [vmem:[%s6567_s2 + $0x78] sm:$0xff]  ;;  %v3879_v37 = vld [vmem:[%s6567_s2 + $0x80] sm:$0xff] }
  0x8e   : > { %4923 = vmatmul.mubr.msk.f32.gmra.mrb[4].mxu1 %vm301_vm0, %v5760_v42  ;;  %5120 = vmatmul.mubr.msk.f32.gmra.mrb[18].mxu0 %vm301_vm0, %v5820_v53 }
  0x8f   : > { %4925 = vmatprep.mubr.msk.f32.mxu1 %vm301_vm0, %v5768_v44  ;;  %5122 = vmatprep.mubr.msk.f32.mxu0 %vm301_vm0, %v5826_v55 }
  0x91   : > { %3948 = vperm.xlu1 %5477, %v3874_v41   ;;  %3953 = vperm.xlu0 %5476, %v3875_v6   ;;  %v2656_v41 = vld [vmem:[%s5574_s8 + $0xf8] sm:$0xff]  ;;  %v3880_v6 = vld [vmem:[%s6567_s2 + $0x88] sm:$0xff] }
  0x92   : > { %4926 = vmatmul.mubr.msk.f32.gmra.mrb[6].mxu1 %vm301_vm0, %v5783_v46  ;;  %5123 = vmatmul.mubr.msk.f32.gmra.mrb[20].mxu0 %vm301_vm0, %v5840_v57 }
  0x93   : > { %4928 = vmatprep.mubr.msk.f32.mxu1 %vm301_vm0, %v5789_v48  ;;  %5125 = vmatprep.mubr.msk.f32.mxu0 %vm301_vm0, %v5846_v59 }
  0x95   : > { %3958 = vperm.xlu1 %5477, %v3876_v32   ;;  %3963 = vperm.xlu0 %5476, %v3877_v34   ;;  %v3881_v32 = vld [vmem:[%s6567_s2 + $0x90] sm:$0xff]  ;;  %v3882_v34 = vld [vmem:[%s6567_s2 + $0x98] sm:$0xff] }
  0x96   : > { %4929 = vmatmul.mubr.msk.f32.gmra.mrb[8].mxu1 %vm301_vm0, %v5803_v50  ;;  %5126 = vmatmul.mubr.msk.f32.gmra.mrb[22].mxu0 %vm301_vm0, %v5860_v61 }
  0x97   : > { %4931 = vmatprep.mubr.msk.f32.mxu1 %vm301_vm0, %v5809_v52  ;;  %5128 = vmatprep.mubr.msk.f32.mxu0 %vm301_vm0, %v6151_v16 }
  0x99   : > { %3968 = vperm.xlu1 %5477, %v3878_v36   ;;  %3973 = vperm.xlu0 %5476, %v3879_v37   ;;  %v6628_v36 = vld [vmem:[#allocation4_spill] sm:$0xff]  ;;  %v6630_v37 = vld [vmem:[#allocation6_spill] sm:$0xff] }
  0x9a   : > { %4932 = vmatmul.mubr.msk.f32.gmra.mrb[10].mxu1 %vm301_vm0, %v5823_v54  ;;  %5129 = vmatmul.mubr.msk.f32.gmra.mrb[24].mxu0 %vm301_vm0, %v6168_v30 }
  0x9b   : > { %4934 = vmatprep.mubr.msk.f32.mxu1 %vm301_vm0, %v5829_v56  ;;  %5131 = vmatprep.mubr.msk.f32.mxu0 %vm301_vm0, %v2655_v35  ;;  %v3883_v35 = vld [vmem:[%s6567_s2 + $0xa0] sm:$0xff] }
  0x9d   : > { %3978 = vperm.xlu1 %5477, %v3880_v6   ;;  %3983 = vperm.xlu0 %5476, %v3881_v32   ;;  %v6633_v6 = vld [vmem:[#allocation9_spill] sm:$0xff]  ;;  %v6634_v32 = vld [vmem:[#allocation10_spill] sm:$0xff] }
  0x9e   : > { %4935 = vmatmul.mubr.msk.f32.gmra.mrb[12].mxu1 %vm301_vm0, %v5843_v58  ;;  %5132 = vmatmul.mubr.msk.f32.gmra.mrb[26].mxu0 %vm301_vm0, %v2656_v41  ;;  %v6631_v41 = vld [vmem:[#allocation7_spill] sm:$0xff] }
  0x9f   : > { %4937 = vmatprep.mubr.msk.f32.mxu1 %vm301_vm0, %v5849_v60  ;;  %5136 = vmatprep.mubr.msk.f32.mxu0 %vm301_vm0, %v5591_v9  ;;  %v3884_v9 = vld [vmem:[%s6567_s2 + $0xa8] sm:$0xff] }
  0xa1   : > { %3988 = vperm.xlu1 %5477, %v3882_v34   ;;  %3993 = vperm.xlu0 %5476, %v3883_v35   ;;  %v6635_v34 = vld [vmem:[#allocation24_spill] sm:$0xff]  ;;  %v6636_v35 = vld [vmem:[#allocation11_spill] sm:$0xff] }
  0xa2   : > { %4938 = vmatmul.mubr.msk.f32.gmra.mrb[14].mxu1 %vm301_vm0, %v5863_v62  ;;  %5137 = vmatmul.mubr.msk.f32.vlgmr.msra.gmra.mrb[0].mxu0 %vm301_vm0, %v5610_v13  ;;  %v3885_v13 = vld [vmem:[%s6567_s2 + $0xb0] sm:$0xff] }
  0xa3   : > { %5179 = vmatpush3.msra.mxu0 %v5984_v2  ;;  %4940 = vmatprep.mubr.msk.f32.mxu1 %vm301_vm0, %v5867_v0  ;;  %v6624_v2 = vld [vmem:[#allocation19_spill] sm:$0xff] }
  0xa4   : > { %5139 = vmatprep.mubr.msk.f32.mxu0 %vm301_vm0, %v5620_v15  ;;  %v3886_v15 = vld [vmem:[%s6567_s2 + $0xb8] sm:$0xff] }
  0xa5   : > { %3998 = vperm.xlu1 %5477, %v3884_v9   ;;  %4003 = vperm.xlu0 %5476, %v3885_v13   ;;  %v6637_v9 = vld [vmem:[#allocation25_spill] sm:$0xff]  ;;  %v6316_v13 = vld [vmem:[%s5574_s8 + $0xe1] sm:$0xff] }
  0xa6   : > { %4941 = vmatmul.mubr.msk.f32.gmra.mrb[16].mxu1 %vm301_vm0, %v5878_v3  ;;  %5140 = vmatmul.mubr.msk.f32.gmra.mrb[2].mxu0 %vm301_vm0, %v5636_v17  ;;  %v3887_v17 = vld [vmem:[%s6567_s2 + $0xc0] sm:$0xff] }
  0xa7   : > { %4943 = vmatprep.mubr.msk.f32.mxu1 %vm301_vm0, %v5881_v4  ;;  %5142 = vmatprep.mubr.msk.f32.mxu0 %vm301_vm0, %v5642_v19  ;;  %v3888_v19 = vld [vmem:[%s6567_s2 + $0xc8] sm:$0xff] }
  0xa9   : > { %4008 = vperm.xlu1 %5477, %v3886_v15   ;;  %4013 = vperm.xlu0 %5476, %v3887_v17   ;;  %v6638_v15 = vld [vmem:[#allocation12_spill] sm:$0xff]  ;;  %v6639_v17 = vld [vmem:[#allocation13_spill] sm:$0xff] }
  0xaa   : > { %4944 = vmatmul.mubr.msk.f32.gmra.mrb[18].mxu1 %vm301_vm0, %v5895_v10  ;;  %5143 = vmatmul.mubr.msk.f32.gmra.mrb[4].mxu0 %vm301_vm0, %v5656_v21  ;;  %v3889_v21 = vld [vmem:[%s6567_s2 + $0xd0] sm:$0xff] }
  0xab   : > { %4946 = vmatprep.mubr.msk.f32.mxu1 %vm301_vm0, %v5900_v63  ;;  %5145 = vmatprep.mubr.msk.f32.mxu0 %vm301_vm0, %v5662_v23  ;;  %v6623_v23 = vld [vmem:[#allocation18_spill] sm:$0xff] }
  0xad   : > { %4018 = vperm.xlu1 %5477, %v3888_v19   ;;  %4023 = vperm.xlu0 %5476, %v3889_v21   ;;  %v6327_v19 = vld [vmem:[%s5574_s8 + $0xe9] sm:$0xff]  ;;  %v3057_v21 = vld [vmem:[%s5574_s8 + $0xf1] sm:$0xff] }
  0xae   : > { %4947 = vmatmul.mubr.msk.f32.gmra.mrb[20].mxu1 %vm301_vm0, %v5912_v5  ;;  %5146 = vmatmul.mubr.msk.f32.gmra.mrb[6].mxu0 %vm301_vm0, %v5676_v25  ;;  %v3890_v25 = vld [vmem:[%s6567_s2 + $0xd8] sm:$0xff] }
  0xaf   : > { %4949 = vmatprep.mubr.msk.f32.mxu1 %vm301_vm0, %v5915_v11  ;;  %5148 = vmatprep.mubr.msk.f32.mxu0 %vm301_vm0, %v5682_v27  ;;  %v6625_v27 = vld [vmem:[#allocation20_spill] sm:$0xff] }
  0xb1   : > { %4028 = vperm.xlu1 %5477, %v3890_v25   ;;  %v6640_v25 = vld [vmem:[#allocation14_spill] sm:$0xff] }
  0xb2   : > { %4950 = vmatmul.mubr.msk.f32.gmra.mrb[22].mxu1 %vm301_vm0, %v6623_v23  ;;  %5149 = vmatmul.mubr.msk.f32.gmra.mrb[8].mxu0 %vm301_vm0, %v5696_v29  ;;  %v6626_v29 = vld [vmem:[#allocation21_spill] sm:$0xff] }
  0xb3   : > { %4952 = vmatprep.mubr.msk.f32.mxu1 %vm301_vm0, %v6624_v2  ;;  %5151 = vmatprep.mubr.msk.f32.mxu0 %vm301_vm0, %v5702_v31  ;;  %v6627_v31 = vld [vmem:[#allocation3_spill] sm:$0xff] }
  0xb6   : > { %4953 = vmatmul.mubr.msk.f32.gmra.mrb[24].mxu1 %vm301_vm0, %v6625_v27  ;;  %5152 = vmatmul.mubr.msk.f32.gmra.mrb[10].mxu0 %vm301_vm0, %v5716_v33  ;;  %v6629_v33 = vld [vmem:[#allocation5_spill] sm:$0xff] }
  0xb7   : > { %4955 = vmatprep.mubr.msk.f32.mxu1 %vm301_vm0, %v5943_v8  ;;  %5154 = vmatprep.mubr.msk.f32.mxu0 %vm301_vm0, %v5979_v7 }
  0xba   : > { %4956 = vmatmul.mubr.msk.f32.gmra.mrb[26].mxu1 %vm301_vm0, %v6626_v29  ;;  %5155 = vmatmul.mubr.msk.f32.gmra.mrb[12].mxu0 %vm301_vm0, %v5994_v12 }
  0xbb   : > { %4960 = vmatprep.mubr.msk.f32.mxu1 %vm301_vm0, %v6627_v31  ;;  %5157 = vmatprep.mubr.msk.f32.mxu0 %vm301_vm0, %v5999_v14  ;;  %v6641_v31 = vld [vmem:[#allocation15_spill] sm:$0xff] }
  0xbe   : > { %4961 = vmatmul.mubr.msk.f32.vlgmr.msra.gmra.mrb[0].mxu1 %vm301_vm0, %v6628_v36  ;;  %5158 = vmatmul.mubr.msk.f32.gmra.mrb[14].mxu0 %vm301_vm0, %v6011_v40  ;;  %v3058_v36 = vld [vmem:[%s5574_s8 + $0xf9] sm:$0xff] }
  0xbf   : > { %5223 = vmatpush3.msra.mxu1 %v5558_v1  ;;  %4963 = vmatprep.mubr.msk.f32.mxu1 %vm301_vm0, %v6629_v33  ;;  %v6632_v1 = vld [vmem:[#allocation8_spill] sm:$0xff] }
  0xc0   : > { %5160 = vmatprep.mubr.msk.f32.mxu0 %vm301_vm0, %v6014_v18  ;;  %v6642_v33 = vld [vmem:[#allocation16_spill] sm:$0xff] }
  0xc2   : > { %4964 = vmatmul.mubr.msk.f32.gmra.mrb[2].mxu1 %vm301_vm0, %v6630_v37  ;;  %5161 = vmatmul.mubr.msk.f32.gmra.mrb[16].mxu0 %vm301_vm0, %v6025_v20  ;;  %v6643_v37 = vld [vmem:[#allocation17_spill] sm:$0xff] }
  0xc3   : > { %4966 = vmatprep.mubr.msk.f32.mxu1 %vm301_vm0, %v6631_v41  ;;  %5163 = vmatprep.mubr.msk.f32.mxu0 %vm301_vm0, %v6028_v22 }
  0xc6   : > { %4967 = vmatmul.mubr.msk.f32.gmra.mrb[4].mxu1 %vm301_vm0, %v6632_v1  ;;  %5164 = vmatmul.mubr.msk.f32.gmra.mrb[18].mxu0 %vm301_vm0, %v6039_v24 }
  0xc7   : > { %4969 = vmatprep.mubr.msk.f32.mxu1 %vm301_vm0, %v6633_v6  ;;  %5166 = vmatprep.mubr.msk.f32.mxu0 %vm301_vm0, %v6042_v26 }
  0xca   : > { %4970 = vmatmul.mubr.msk.f32.gmra.mrb[6].mxu1 %vm301_vm0, %v6634_v32  ;;  %5167 = vmatmul.mubr.msk.f32.gmra.mrb[20].mxu0 %vm301_vm0, %v6635_v34 }
  0xcb   : > { %4972 = vmatprep.mubr.msk.f32.mxu1 %vm301_vm0, %v6636_v35  ;;  %5169 = vmatprep.mubr.msk.f32.mxu0 %vm301_vm0, %v6637_v9 }
  0xce   : > { %4973 = vmatmul.mubr.msk.f32.gmra.mrb[8].mxu1 %vm301_vm0, %v6638_v15  ;;  %5170 = vmatmul.mubr.msk.f32.gmra.mrb[22].mxu0 %vm301_vm0, %v6076_v28 }
  0xcf   : > { %4975 = vmatprep.mubr.msk.f32.mxu1 %vm301_vm0, %v6639_v17  ;;  %5172 = vmatprep.mubr.msk.f32.mxu0 %vm301_vm0, %v6316_v13 }
  0xd2   : > { %4976 = vmatmul.mubr.msk.f32.gmra.mrb[10].mxu1 %vm301_vm0, %v6640_v25  ;;  %5173 = vmatmul.mubr.msk.f32.gmra.mrb[24].mxu0 %vm301_vm0, %v6327_v19 }
  0xd3   : > { %4978 = vmatprep.mubr.msk.f32.mxu1 %vm301_vm0, %v6641_v31  ;;  %5175 = vmatprep.mubr.msk.f32.mxu0 %vm301_vm0, %v3057_v21 }
  0xd6   : > { %4979 = vmatmul.mubr.msk.f32.gmra.mrb[12].mxu1 %vm301_vm0, %v6642_v33  ;;  %5176 = vmatmul.mubr.msk.f32.gmra.mrb[26].mxu0 %vm301_vm0, %v3058_v36 }
  0xd7   : > { %4981 = vmatprep.mubr.msk.f32.mxu1 %vm301_vm0, %v5739_v38  ;;  %5180 = vmatprep.mubr.msk.f32.mxu0 %vm301_vm0, %v5742_v39 }
  0xda   : > { %4982 = vmatmul.mubr.msk.f32.gmra.mrb[14].mxu1 %vm301_vm0, %v6643_v37  ;;  %5181 = vmatmul.mubr.msk.f32.vlgmr.msra.gmra.mrb[0].mxu0 %vm301_vm0, %v5760_v42 }
  0xdb   : > { %4984 = vmatprep.mubr.msk.f32.mxu1 %vm301_vm0, %v5765_v43  ;;  %5183 = vmatprep.mubr.msk.f32.mxu0 %vm301_vm0, %v5768_v44 }
  0xde   : > { %4985 = vmatmul.mubr.msk.f32.gmra.mrb[16].mxu1 %vm301_vm0, %v5780_v45  ;;  %5184 = vmatmul.mubr.msk.f32.gmra.mrb[2].mxu0 %vm301_vm0, %v5783_v46 }
  0xdf   : > { %4987 = vmatprep.mubr.msk.f32.mxu1 %vm301_vm0, %v5786_v47  ;;  %5186 = vmatprep.mubr.msk.f32.mxu0 %vm301_vm0, %v5789_v48 }
  0xe2   : > { %4988 = vmatmul.mubr.msk.f32.gmra.mrb[18].mxu1 %vm301_vm0, %v5800_v49  ;;  %5187 = vmatmul.mubr.msk.f32.gmra.mrb[4].mxu0 %vm301_vm0, %v5803_v50 }
  0xe3   : > { %4990 = vmatprep.mubr.msk.f32.mxu1 %vm301_vm0, %v5806_v51  ;;  %5189 = vmatprep.mubr.msk.f32.mxu0 %vm301_vm0, %v5809_v52 }
  0xe6   : > { %4991 = vmatmul.mubr.msk.f32.gmra.mrb[20].mxu1 %vm301_vm0, %v5820_v53  ;;  %5190 = vmatmul.mubr.msk.f32.gmra.mrb[6].mxu0 %vm301_vm0, %v5823_v54 }
  0xe7   : > { %4993 = vmatprep.mubr.msk.f32.mxu1 %vm301_vm0, %v5826_v55  ;;  %5192 = vmatprep.mubr.msk.f32.mxu0 %vm301_vm0, %v5829_v56 }
  0xea   : > { %4994 = vmatmul.mubr.msk.f32.gmra.mrb[22].mxu1 %vm301_vm0, %v5840_v57  ;;  %5193 = vmatmul.mubr.msk.f32.gmra.mrb[8].mxu0 %vm301_vm0, %v5843_v58 }
  0xeb   : > { %4996 = vmatprep.mubr.msk.f32.mxu1 %vm301_vm0, %v5846_v59  ;;  %5195 = vmatprep.mubr.msk.f32.mxu0 %vm301_vm0, %v5849_v60 }
  0xee   : > { %4997 = vmatmul.mubr.msk.f32.gmra.mrb[24].mxu1 %vm301_vm0, %v5860_v61  ;;  %5196 = vmatmul.mubr.msk.f32.gmra.mrb[10].mxu0 %vm301_vm0, %v5863_v62 }
  0xef   : > { %4999 = vmatprep.mubr.msk.f32.mxu1 %vm301_vm0, %v6151_v16  ;;  %5198 = vmatprep.mubr.msk.f32.mxu0 %vm301_vm0, %v5867_v0 }
  0xf2   : > { %5000 = vmatmul.mubr.msk.f32.gmra.mrb[26].mxu1 %vm301_vm0, %v6168_v30  ;;  %5199 = vmatmul.mubr.msk.f32.gmra.mrb[12].mxu0 %vm301_vm0, %v5878_v3 }
  0xf3   : > { %5025 = vmatprep.mubr.msk.f32.mxu1 %vm301_vm0, %v5979_v7  ;;  %5201 = vmatprep.mubr.msk.f32.mxu0 %vm301_vm0, %v5881_v4 }
  0xf6   : > { %5026 = vmatmul.mubr.msk.f32.vlgmr.msra.gmra.mrb[14].mxu1 %vm301_vm0, %v5994_v12  ;;  %5202 = vmatmul.mubr.msk.f32.gmra.mrb[14].mxu0 %vm301_vm0, %v5895_v10  ;;  %v6644_v12 = vld [vmem:[#allocation22_spill] sm:$0xff] }
  0xf7   : > { %5028 = vmatprep.mubr.msk.f32.mxu1 %vm301_vm0, %v5999_v14  ;;  %5204 = vmatprep.mubr.msk.f32.mxu0 %vm301_vm0, %v5900_v63  ;;  %v3459_v14 = vld [vmem:[%s5574_s8 + $0xf2] sm:$0xff] }
  0xfa   : > { %5029 = vmatmul.mubr.msk.f32.gmra.mrb[16].mxu1 %vm301_vm0, %v6011_v40  ;;  %5205 = vmatmul.mubr.msk.f32.gmra.mrb[16].mxu0 %vm301_vm0, %v5912_v5 }
  0xfb   : > { %5031 = vmatprep.mubr.msk.f32.mxu1 %vm301_vm0, %v6014_v18  ;;  %5207 = vmatprep.mubr.msk.f32.mxu0 %vm301_vm0, %v5915_v11  ;;  %v6645_v18 = vld [vmem:[#allocation23_spill] sm:$0xff] }
  0xfe   : > { %5032 = vmatmul.mubr.msk.f32.gmra.mrb[18].mxu1 %vm301_vm0, %v6025_v20  ;;  %5208 = vmatmul.mubr.msk.f32.gmra.mrb[18].mxu0 %vm301_vm0, %v6623_v23  ;;  %v5503_v20 = vmov 0.0  }
  0xff   : > { %5034 = vmatprep.mubr.msk.f32.mxu1 %vm301_vm0, %v6028_v22  ;;  %5210 = vmatprep.mubr.msk.f32.mxu0 %vm301_vm0, %v6624_v2  ;;  %270 = vst [vmem:[%s6457_s17] sm:$0x1] %v5503_v20  ;;  %271 = vst [vmem:[%s6463_s24] sm:$0x1] %v5503_v20  ;;  %v3894_v22 = vpop.permute.xlu0 %3893 }
 0x102   : > { %5035 = vmatmul.mubr.msk.f32.gmra.mrb[20].mxu1 %vm301_vm0, %v6039_v24  ;;  %5211 = vmatmul.mubr.msk.f32.gmra.mrb[20].mxu0 %vm301_vm0, %v6625_v27  ;;  %v3904_v24 = vpop.permute.xlu1 %3903 }
 0x103   : > { %5037 = vmatprep.mubr.msk.f32.mxu1 %vm301_vm0, %v6042_v26  ;;  %5213 = vmatprep.mubr.msk.f32.mxu0 %vm301_vm0, %v5943_v8  ;;  %v3460_v8 = vld [vmem:[%s5574_s8 + $0xfa] sm:$0xff]  ;;  %v3899_v39 = vpop.permute.xlu0 %3898  ;;  %s5449_s8 = smul.u32 224, %s6651_s18 }
 0x105   : > { %s6489_s27 = scalar_lea.vmem %s6568_s3, %s5449_s8 }
 0x106   : > { %5038 = vmatmul.mubr.msk.f32.gmra.mrb[22].mxu1 %vm301_vm0, %v6635_v34  ;;  %5214 = vmatmul.mubr.msk.f32.gmra.mrb[22].mxu0 %vm301_vm0, %v6626_v29  ;;  %v3909_v43 = vpop.permute.xlu1 %3908 }
 0x107   : > { %5040 = vmatprep.mubr.msk.f32.mxu1 %vm301_vm0, %v6637_v9  ;;  %5216 = vmatprep.mubr.msk.f32.mxu0 %vm301_vm0, %v6644_v12  ;;  %v3914_v47 = vpop.permute.xlu0 %3913 }
 0x10a   : > { %5041 = vmatmul.mubr.msk.f32.gmra.mrb[24].mxu1 %vm301_vm0, %v6076_v28  ;;  %5217 = vmatmul.mubr.msk.f32.gmra.mrb[24].mxu0 %vm301_vm0, %v6645_v18  ;;  %v3919_v48 = vpop.permute.xlu1 %3918 }
 0x10b   : > { %5043 = vmatprep.mubr.msk.f32.mxu1 %vm301_vm0, %v6316_v13  ;;  %5219 = vmatprep.mubr.msk.f32.mxu0 %vm301_vm0, %v3459_v14  ;;  %v3924_v51 = vpop.permute.xlu0 %3923 }
 0x10e   : > { %5044 = vmatmul.mubr.msk.f32.gmra.mrb[26].mxu1 %vm301_vm0, %v6327_v19  ;;  %5220 = vmatmul.mubr.msk.f32.gmra.mrb[26].mxu0 %vm301_vm0, %v3460_v8  ;;  %v3929_v53 = vpop.permute.xlu1 %3928 }
 0x10f   : > { %v6475_v57 = vpop.permute.xlu0 %3933 }
 0x112   : > { %v6477_v58 = vpop.permute.xlu1 %3938 }
 0x113   : > { %v6484_v61 = vpop.permute.xlu0 %3943 }
 0x116   : > { %v6491_v0 = vpop.permute.xlu1 %3948 }
 0x117   : > { %v6495_v16 = vpop.permute.xlu0 %3953 }
 0x11a   : > { %v6497_v27 = vpop.permute.xlu1 %3958 }
 0x11b   : > { %v6502_v17 = vpop.permute.xlu0 %3963 }
 0x11e   : > { %v6505_v33 = vpop.permute.xlu1 %3968 }
 0x191   : > { %v4962_v26 = vpop.f32.mrb[0].mxu1 }
 0x192   : > { %v1602_v38 = vpop.f32.mrb[1].mxu1 }
 0x195   : > { %v4965_v42 = vpop.f32.mrb[2].mxu1 }
 0x196   : > { %v1612_v44 = vpop.f32.mrb[3].mxu1 }
 0x199   : > { %v4968_v45 = vpop.f32.mrb[4].mxu1 }
 0x19a   : > { %v1622_v46 = vpop.f32.mrb[5].mxu1 }
 0x19d   : > { %v4971_v49 = vpop.f32.mrb[6].mxu1 }
 0x19e   : > { %v1632_v50 = vpop.f32.mrb[7].mxu1 }
 0x1a1   : > { %v6467_v52 = vpop.f32.mrb[8].mxu1 }
 0x1a2   : > { %v6469_v54 = vpop.f32.mrb[9].mxu1 }
 0x1a5   : > { %v6471_v55 = vpop.f32.mrb[10].mxu1 }
 0x1a6   : > { %v6473_v56 = vpop.f32.mrb[11].mxu1 }
 0x1a9   : > { %v6479_v59 = vpop.f32.mrb[12].mxu1 }
 0x1aa   : > { %v6482_v60 = vpop.f32.mrb[13].mxu1 }
 0x1ad   : > { %v5182_v62 = vpop.f32.mrb[0].mxu0 }
 0x1ae   : > { %v5224_v3 = vadd.f32 %v5182_v62, %v4962_v26  ;;  %v3612_v4 = vpop.f32.mrb[1].mxu0 }
 0x1af   : > { %v5225_v10 = vadd.f32 %v3612_v4, %v1602_v38 }
 0x1b0   : > { %v4032_v63 = vmul.f32 %v5224_v3, %v3899_v39  ;;  %4160 = vst [vmem:[%s6489_s27 + $0x8] sm:$0xff] %v5224_v3 }
 0x1b1   : > { %v4031_v5 = vmul.f32 %v5225_v10, %v3894_v22  ;;  %4159 = vst [vmem:[%s6489_s27] sm:$0xff] %v5225_v10  ;;  %v5185_v11 = vpop.f32.mrb[2].mxu0 }
 0x1b2   : > { %v4097_v7 = vmul.f32 %v4032_v63, %v4032_v63  ;;  %v5226_v40 = vadd.f32 %v5185_v11, %v4965_v42  ;;  %v3622_v28 = vpop.f32.mrb[3].mxu0 }
 0x1b3   : > { %v4060_v30 = vadd.f32 %v4032_v63, %v4031_v5  ;;  %v4096_v23 = vmul.f32 %v4031_v5, %v4031_v5  ;;  %v5227_v2 = vadd.f32 %v3622_v28, %v1612_v44 }
 0x1b4   : > { %4162 = vst [vmem:[%s6489_s27 + $0x18] sm:$0xff] %v5226_v40  ;;  %v4034_v41 = vmul.f32 %v5226_v40, %v3909_v43 }
 0x1b5   : > { %v4124_v29 = vadd.f32 %v4097_v7, %v4096_v23  ;;  %v4033_v1 = vmul.f32 %v5227_v2, %v3904_v24  ;;  %4161 = vst [vmem:[%s6489_s27 + $0x10] sm:$0xff] %v5227_v2  ;;  %v5188_v6 = vpop.f32.mrb[4].mxu0 }
 0x1b6   : > { %v5228_v32 = vadd.f32 %v5188_v6, %v4968_v45  ;;  %v3632_v34 = vpop.f32.mrb[5].mxu0  ;;  %v4099_v19 = vmul.f32 %v4034_v41, %v4034_v41  ;;  %v6510_v45 = vpop.permute.xlu0 %3973 }
 0x1b7   : > { %v4061_v35 = vadd.f32 %v4060_v30, %v4033_v1  ;;  %v4098_v9 = vmul.f32 %v4033_v1, %v4033_v1  ;;  %v5229_v13 = vadd.f32 %v3632_v34, %v1622_v46 }
 0x1b8   : > { %v4036_v15 = vmul.f32 %v5228_v32, %v3919_v48  ;;  %4164 = vst [vmem:[%s6489_s27 + $0x28] sm:$0xff] %v5228_v32 }
 0x1b9   : > { %v4125_v21 = vadd.f32 %v4124_v29, %v4098_v9  ;;  %v4035_v25 = vmul.f32 %v5229_v13, %v3914_v47  ;;  %v4062_v31 = vadd.f32 %v4061_v35, %v4034_v41  ;;  %4163 = vst [vmem:[%s6489_s27 + $0x20] sm:$0xff] %v5229_v13  ;;  %v5191_v36 = vpop.f32.mrb[6].mxu0 }
 0x1ba   : > { %v5230_v37 = vadd.f32 %v5191_v36, %v4971_v49  ;;  %v3642_v12 = vpop.f32.mrb[7].mxu0  ;;  %v4101_v22 = vmul.f32 %v4036_v15, %v4036_v15 }
 0x1bb   : > { %v4063_v14 = vadd.f32 %v4062_v31, %v4035_v25  ;;  %v4100_v18 = vmul.f32 %v4035_v25, %v4035_v25  ;;  %v4126_v8 = vadd.f32 %v4125_v21, %v4099_v19  ;;  %v5231_v20 = vadd.f32 %v3642_v12, %v1632_v50  ;;  %v6513_v50 = vpop.permute.xlu1 %3978 }
 0x1bc   : > { %4166 = vst [vmem:[%s6489_s27 + $0x38] sm:$0xff] %v5230_v37  ;;  %v4038_v26 = vmul.f32 %v5230_v37, %v3929_v53 }
 0x1bd   : > { %v4127_v24 = vadd.f32 %v4126_v8, %v4100_v18  ;;  %v4037_v38 = vmul.f32 %v5231_v20, %v3924_v51  ;;  %v4064_v39 = vadd.f32 %v4063_v14, %v4036_v15  ;;  %4165 = vst [vmem:[%s6489_s27 + $0x30] sm:$0xff] %v5231_v20  ;;  %v5194_v42 = vpop.f32.mrb[8].mxu0 }
 0x1be   : > { %v5232_v43 = vadd.f32 %v5194_v42, %v6467_v52  ;;  %v3652_v44 = vpop.f32.mrb[9].mxu0  ;;  %v4103_v51 = vmul.f32 %v4038_v26, %v4038_v26 }
 0x1bf   : > { %v4065_v46 = vadd.f32 %v4064_v39, %v4037_v38  ;;  %v4102_v47 = vmul.f32 %v4037_v38, %v4037_v38  ;;  %v4128_v48 = vadd.f32 %v4127_v24, %v4101_v22  ;;  %v5233_v49 = vadd.f32 %v3652_v44, %v6469_v54  ;;  %v3989_v2 = vpop.permute.xlu1 %3988 }
 0x1c0   : > { %v4040_v53 = vmul.f32 %v5232_v43, %v6477_v58  ;;  %4168 = vst [vmem:[%s6489_s27 + $0x48] sm:$0xff] %v5232_v43  ;;  %v6522_v58 = vpop.permute.xlu0 %3983 }
 0x1c1   : > { %v4129_v62 = vadd.f32 %v4128_v48, %v4102_v47  ;;  %v4039_v3 = vmul.f32 %v5233_v49, %v6475_v57  ;;  %v4066_v4 = vadd.f32 %v4065_v46, %v4038_v26  ;;  %4167 = vst [vmem:[%s6489_s27 + $0x40] sm:$0xff] %v5233_v49  ;;  %v5197_v52 = vpop.f32.mrb[10].mxu0 }
 0x1c2   : > { %v5234_v10 = vadd.f32 %v5197_v52, %v6471_v55  ;;  %v3662_v63 = vpop.f32.mrb[11].mxu0  ;;  %v4105_v40 = vmul.f32 %v4040_v53, %v4040_v53 }
 0x1c3   : > { %v4067_v5 = vadd.f32 %v4066_v4, %v4039_v3  ;;  %v4104_v11 = vmul.f32 %v4039_v3, %v4039_v3  ;;  %v4130_v54 = vadd.f32 %v4129_v62, %v4103_v51  ;;  %v5235_v7 = vadd.f32 %v3662_v63, %v6473_v56 }
 0x1c4   : > { %4170 = vst [vmem:[%s6489_s27 + $0x58] sm:$0xff] %v5234_v10  ;;  %v4042_v57 = vmul.f32 %v5234_v10, %v6491_v0  ;;  %v3994_v37 = vpop.permute.xlu0 %3993 }
 0x1c5   : > { %v4131_v28 = vadd.f32 %v4130_v54, %v4104_v11  ;;  %v4041_v30 = vmul.f32 %v5235_v7, %v6484_v61  ;;  %v4068_v23 = vadd.f32 %v4067_v5, %v4040_v53  ;;  %4169 = vst [vmem:[%s6489_s27 + $0x50] sm:$0xff] %v5235_v7  ;;  %v5200_v55 = vpop.f32.mrb[12].mxu0 }
 0x1c6   : > { %v5236_v29 = vadd.f32 %v5200_v55, %v6479_v59  ;;  %v3672_v41 = vpop.f32.mrb[13].mxu0  ;;  %v4107_v35 = vmul.f32 %v4042_v57, %v4042_v57 }
 0x1c7   : > { %v4069_v1 = vadd.f32 %v4068_v23, %v4041_v30  ;;  %v4106_v56 = vmul.f32 %v4041_v30, %v4041_v30  ;;  %v4132_v6 = vadd.f32 %v4131_v28, %v4105_v40  ;;  %v5237_v32 = vadd.f32 %v3672_v41, %v6482_v60 }
 0x1c8   : > { %v4044_v34 = vmul.f32 %v5236_v29, %v6497_v27  ;;  %4172 = vst [vmem:[%s6489_s27 + $0x68] sm:$0xff] %v5236_v29  ;;  %v3999_v27 = vpop.permute.xlu1 %3998  ;;  %v4004_v5 = vpop.permute.xlu0 %4003 }
 0x1c9   : > { %v4133_v0 = vadd.f32 %v4132_v6, %v4106_v56  ;;  %v4043_v61 = vmul.f32 %v5237_v32, %v6495_v16  ;;  %v4070_v9 = vadd.f32 %v4069_v1, %v4042_v57  ;;  %4171 = vst [vmem:[%s6489_s27 + $0x60] sm:$0xff] %v5237_v32  ;;  %v5027_v13 = vpop.f32.mrb[14].mxu1  ;;  %v5203_v15 = vpop.f32.mrb[14].mxu0 }
 0x1ca   : > { %v5238_v59 = vadd.f32 %v5203_v15, %v5027_v13  ;;  %v2074_v19 = vpop.f32.mrb[15].mxu1  ;;  %v3682_v21 = vpop.f32.mrb[15].mxu0  ;;  %v4109_v12 = vmul.f32 %v4044_v34, %v4044_v34 }
 0x1cb   : > { %v4071_v25 = vadd.f32 %v4070_v9, %v4043_v61  ;;  %v4108_v31 = vmul.f32 %v4043_v61, %v4043_v61  ;;  %v4134_v36 = vadd.f32 %v4133_v0, %v4107_v35  ;;  %v5239_v60 = vadd.f32 %v3682_v21, %v2074_v19 }
 0x1cc   : > { %4174 = vst [vmem:[%s6489_s27 + $0x78] sm:$0xff] %v5238_v59  ;;  %v4046_v16 = vmul.f32 %v5238_v59, %v6505_v33 }
 0x1cd   : > { %v4135_v14 = vadd.f32 %v4134_v36, %v4108_v31  ;;  %v4045_v18 = vmul.f32 %v5239_v60, %v6502_v17  ;;  %v4072_v8 = vadd.f32 %v4071_v25, %v4044_v34  ;;  %4173 = vst [vmem:[%s6489_s27 + $0x70] sm:$0xff] %v5239_v60  ;;  %v5030_v20 = vpop.f32.mrb[16].mxu1  ;;  %v5206_v22 = vpop.f32.mrb[16].mxu0 }
 0x1ce   : > { %v5240_v24 = vadd.f32 %v5206_v22, %v5030_v20  ;;  %v2084_v26 = vpop.f32.mrb[17].mxu1  ;;  %v3692_v38 = vpop.f32.mrb[17].mxu0  ;;  %v4111_v47 = vmul.f32 %v4046_v16, %v4046_v16 }
 0x1cf   : > { %v4073_v39 = vadd.f32 %v4072_v8, %v4045_v18  ;;  %v4110_v42 = vmul.f32 %v4045_v18, %v4045_v18  ;;  %v4136_v43 = vadd.f32 %v4135_v14, %v4109_v12  ;;  %v5241_v44 = vadd.f32 %v3692_v38, %v2084_v26  ;;  %v4014_v25 = vpop.permute.xlu0 %4013 }
 0x1d0   : > { %v4048_v46 = vmul.f32 %v5240_v24, %v6513_v50  ;;  %4176 = vst [vmem:[%s6489_s27 + $0x88] sm:$0xff] %v5240_v24  ;;  %v4009_v50 = vpop.permute.xlu1 %4008 }
 0x1d1   : > { %v4137_v48 = vadd.f32 %v4136_v43, %v4110_v42  ;;  %v4047_v17 = vmul.f32 %v5241_v44, %v6510_v45  ;;  %v4074_v33 = vadd.f32 %v4073_v39, %v4046_v16  ;;  %4175 = vst [vmem:[%s6489_s27 + $0x80] sm:$0xff] %v5241_v44  ;;  %v5033_v49 = vpop.f32.mrb[18].mxu1  ;;  %v5209_v53 = vpop.f32.mrb[18].mxu0 }
 0x1d2   : > { %v5242_v51 = vadd.f32 %v5209_v53, %v5033_v49  ;;  %v2094_v62 = vpop.f32.mrb[19].mxu1  ;;  %v3702_v3 = vpop.f32.mrb[19].mxu0  ;;  %v4113_v11 = vmul.f32 %v4048_v46, %v4048_v46 }
 0x1d3   : > { %v4075_v4 = vadd.f32 %v4074_v33, %v4047_v17  ;;  %v4112_v52 = vmul.f32 %v4047_v17, %v4047_v17  ;;  %v4138_v10 = vadd.f32 %v4137_v48, %v4111_v47  ;;  %v5243_v63 = vadd.f32 %v3702_v3, %v2094_v62 }
 0x1d4   : > { %4178 = vst [vmem:[%s6489_s27 + $0x98] sm:$0xff] %v5242_v51  ;;  %v4050_v7 = vmul.f32 %v5242_v51, %v3989_v2  ;;  %v4019_v31 = vpop.permute.xlu1 %4018 }
 0x1d5   : > { %v4139_v54 = vadd.f32 %v4138_v10, %v4112_v52  ;;  %v4049_v45 = vmul.f32 %v5243_v63, %v6522_v58  ;;  %v4076_v40 = vadd.f32 %v4075_v4, %v4048_v46  ;;  %4177 = vst [vmem:[%s6489_s27 + $0x90] sm:$0xff] %v5243_v63  ;;  %v5036_v28 = vpop.f32.mrb[20].mxu1  ;;  %v5212_v57 = vpop.f32.mrb[20].mxu0 }
 0x1d6   : > { %v5244_v30 = vadd.f32 %v5212_v57, %v5036_v28  ;;  %v2104_v23 = vpop.f32.mrb[21].mxu1  ;;  %v3712_v55 = vpop.f32.mrb[21].mxu0  ;;  %v4115_v32 = vmul.f32 %v4050_v7, %v4050_v7 }
 0x1d7   : > { %v4077_v29 = vadd.f32 %v4076_v40, %v4049_v45  ;;  %v4114_v41 = vmul.f32 %v4049_v45, %v4049_v45  ;;  %v4140_v1 = vadd.f32 %v4139_v54, %v4113_v11  ;;  %v5245_v56 = vadd.f32 %v3712_v55, %v2104_v23  ;;  %v4024_v4 = vpop.permute.xlu0 %4023 }
 0x1d8   : > { %v4052_v6 = vmul.f32 %v5244_v30, %v3999_v27  ;;  %4180 = vst [vmem:[%s6489_s27 + $0xa8] sm:$0xff] %v5244_v30  ;;  %v4029_v52 = vpop.permute.xlu1 %4028 }
 0x1d9   : > { %v4141_v34 = vadd.f32 %v4140_v1, %v4114_v41  ;;  %v4051_v2 = vmul.f32 %v5245_v56, %v3994_v37  ;;  %v4078_v35 = vadd.f32 %v4077_v29, %v4050_v7  ;;  %4179 = vst [vmem:[%s6489_s27 + $0xa0] sm:$0xff] %v5245_v56  ;;  %v5039_v58 = vpop.f32.mrb[22].mxu1  ;;  %v5215_v0 = vpop.f32.mrb[22].mxu0 }
 0x1da   : > { %v5246_v61 = vadd.f32 %v5215_v0, %v5039_v58  ;;  %v2114_v9 = vpop.f32.mrb[23].mxu1  ;;  %v3722_v13 = vpop.f32.mrb[23].mxu0  ;;  %v4117_v36 = vmul.f32 %v4052_v6, %v4052_v6  ;;  %v4095_v0 = vld [vmem:[%s6463_s24] sm:$0x1] }
 0x1db   : > { %v4079_v15 = vadd.f32 %v4078_v35, %v4051_v2  ;;  %v4116_v59 = vmul.f32 %v4051_v2, %v4051_v2  ;;  %v4142_v19 = vadd.f32 %v4141_v34, %v4115_v32  ;;  %v5247_v21 = vadd.f32 %v3722_v13, %v2114_v9  ;;  %v4059_v2 = vld [vmem:[%s6457_s17] sm:$0x1] }
 0x1dc   : > { %4182 = vst [vmem:[%s6489_s27 + $0xb8] sm:$0xff] %v5246_v61  ;;  %v4054_v27 = vmul.f32 %v5246_v61, %v4009_v50 }
 0x1dd   : > { %v4143_v60 = vadd.f32 %v4142_v19, %v4116_v59  ;;  %v4053_v37 = vmul.f32 %v5247_v21, %v4004_v5  ;;  %v4080_v12 = vadd.f32 %v4079_v15, %v4052_v6  ;;  %4181 = vst [vmem:[%s6489_s27 + $0xb0] sm:$0xff] %v5247_v21  ;;  %v5042_v14 = vpop.f32.mrb[24].mxu1  ;;  %v5218_v16 = vpop.f32.mrb[24].mxu0 }
 0x1de   : > { %v5248_v18 = vadd.f32 %v5218_v16, %v5042_v14  ;;  %v2124_v8 = vpop.f32.mrb[25].mxu1  ;;  %v3732_v20 = vpop.f32.mrb[25].mxu0  ;;  %v4119_v42 = vmul.f32 %v4054_v27, %v4054_v27 }
 0x1df   : > { %v4081_v22 = vadd.f32 %v4080_v12, %v4053_v37  ;;  %v4118_v24 = vmul.f32 %v4053_v37, %v4053_v37  ;;  %v4144_v26 = vadd.f32 %v4143_v60, %v4117_v36  ;;  %v5249_v38 = vadd.f32 %v3732_v20, %v2124_v8 }
 0x1e0   : > { %v4056_v39 = vmul.f32 %v5248_v18, %v4019_v31  ;;  %4184 = vst [vmem:[%s6489_s27 + $0xc8] sm:$0xff] %v5248_v18 }
 0x1e1   : > { %v4145_v43 = vadd.f32 %v4144_v26, %v4118_v24  ;;  %v4055_v44 = vmul.f32 %v5249_v38, %v4014_v25  ;;  %v4082_v46 = vadd.f32 %v4081_v22, %v4054_v27  ;;  %4183 = vst [vmem:[%s6489_s27 + $0xc0] sm:$0xff] %v5249_v38  ;;  %v5045_v47 = vpop.f32.mrb[26].mxu1  ;;  %v5221_v48 = vpop.f32.mrb[26].mxu0 }
 0x1e2   : > { %v5250_v17 = vadd.f32 %v5221_v48, %v5045_v47  ;;  %v2134_v33 = vpop.f32.mrb[27].mxu1  ;;  %v3742_v49 = vpop.f32.mrb[27].mxu0  ;;  %v4121_v10 = vmul.f32 %v4056_v39, %v4056_v39 }
 0x1e3   : > { %v4083_v53 = vadd.f32 %v4082_v46, %v4055_v44  ;;  %v4120_v51 = vmul.f32 %v4055_v44, %v4055_v44  ;;  %v4146_v62 = vadd.f32 %v4145_v43, %v4119_v42  ;;  %v5251_v3 = vadd.f32 %v3742_v49, %v2134_v33 }
 0x1e4   : > { %4186 = vst [vmem:[%s6489_s27 + $0xd8] sm:$0xff] %v5250_v17  ;;  %v4058_v5 = vmul.f32 %v5250_v17, %v4029_v52 }
 0x1e5   : > { %v4147_v63 = vadd.f32 %v4146_v62, %v4120_v51  ;;  %v4057_v50 = vmul.f32 %v5251_v3, %v4024_v4  ;;  %v4084_v11 = vadd.f32 %v4083_v53, %v4056_v39  ;;  %4185 = vst [vmem:[%s6489_s27 + $0xd0] sm:$0xff] %v5251_v3 }
 0x1e6   : > { %v4123_v40 = vmul.f32 %v4058_v5, %v4058_v5 }
 0x1e7   : > { %v4085_v54 = vadd.f32 %v4084_v11, %v4057_v50  ;;  %v4122_v7 = vmul.f32 %v4057_v50, %v4057_v50  ;;  %v4148_v45 = vadd.f32 %v4147_v63, %v4121_v10 }
 0x1e9   : > { %v4086_v28 = vadd.f32 %v4085_v54, %v4058_v5  ;;  %v4149_v57 = vadd.f32 %v4148_v45, %v4122_v7 }
 0x1eb   : > { %v4087_v30 = vrot.slane %v4086_v28, 4  ;;  %v4150_v23 = vadd.f32 %v4149_v57, %v4123_v40 }
 0x1ed   : > { %v4088_v55 = vadd.f32 %v4087_v30, %v4086_v28  ;;  %v4151_v29 = vrot.slane %v4150_v23, 4 }
 0x1ef   : > { %v4089_v41 = vrot.slane %v4088_v55, 2  ;;  %v4152_v1 = vadd.f32 %v4151_v29, %v4150_v23 }
 0x1f1   : > { %v4090_v56 = vadd.f32 %v4089_v41, %v4088_v55  ;;  %v4153_v6 = vrot.slane %v4152_v1, 2 }
 0x1f3   : > { %v4091_v32 = vrot.slane %v4090_v56, 1  ;;  %v4154_v34 = vadd.f32 %v4153_v6, %v4152_v1 }
 0x1f5   : > { %v4092_v35 = vadd.f32 %v4091_v32, %v4090_v56  ;;  %v4155_v58 = vrot.slane %v4154_v34, 1 }
 0x1f7   : > { %v4093_v61 = vadd.f32 %v4092_v35, %v4059_v2  ;;  %v4156_v9 = vadd.f32 %v4155_v58, %v4154_v34 }
 0x1f9   : > { %4094 = vst [vmem:[%s6457_s17] sm:$0x1] %v4093_v61  ;;  %v4157_v13 = vadd.f32 %v4156_v9, %v4095_v0 }
 0x1fb   : > { %4158 = vst [vmem:[%s6463_s24] sm:$0x1] %v4157_v13 }
 0x1fc PF: > { %s16_s20 = sadd.s32 1, %s5500_s20   ;;  %s6646_s18 = smov %s5496_s19 }
 0x1fd   : > { %p13_p5 = scmp.ge.s32.totalorder %s16_s20, 4   ;;  %s6647_s19 = smov %s6649_s21 }
 0x1ff   :  { %15 = sbr.rel (!%p13_p5) target bundleno = 2 (0x2), region = 90 }

</bundles_post_ra>
